<compile_context>
chip_gen: v7x
topology: tpu7x:2x2x1
jax: 0.10.0
libtpu: 0.0.40
codegen_flags: <defaults>
</compile_context>

<pallas_src>
import math
import numpy as np

import jax
import jax.numpy as jnp
from jax.experimental import pallas as pl
from jax.experimental.pallas import tpu as pltpu

# ---------------- model config (consistent with VRAEIAF.__init__) -----------
BATCH        = 64          # small deterministic test batch
INPUT_DIM    = 32
LATENT       = 16          # latent_features
ENC_HIDDEN   = 32          # encoder_hidden_size
DEC_HIDDEN   = 32          # decoder_hidden_size
FLOW_DEPTH   = 2
FLOW_HIDDEN  = 32          # flow_hidden_features
FLOW_CTX     = 8           # flow_context_features
OUTPUT_DIM   = INPUT_DIM   # output_dim defaults to input_dim

ENC_OUT = 2 * LATENT + FLOW_CTX   # encoder output: [mu | log_sigma | context]
DEC_OUT = 2 * OUTPUT_DIM          # decoder output: [mu_x | log_sigma_x]
FLOW_H2 = 2 * FLOW_HIDDEN         # fused m/s hidden width (64)
LAT2    = 2 * LATENT              # fused m/s output width (32)
CTX_ALL = FLOW_DEPTH * FLOW_H2    # fused ctx projection width (128)

_HALF_LOG_2PI = 0.5 * math.log(2.0 * math.pi)

# packed bias rows (one (NBIAS, BIAS_W) f32 array)
_B_ENC1 = 0                      # be1            (ENC_HIDDEN)
_B_MULS = 1                      # [bmu | bls]    (LAT2)
_B_CTX  = 2                      # bctx           (FLOW_CTX)
_B_FB1  = 3                      # fused flow b1  (CTX_ALL)
_B_FB2  = 4                      # fused flow b2, one row per step (LAT2)
_B_DEC1 = 4 + FLOW_DEPTH         # bd1            (DEC_HIDDEN)
_B_DEC2 = 5 + FLOW_DEPTH         # bd2            (DEC_OUT)
NBIAS   = 6 + FLOW_DEPTH
BIAS_W  = max(128, CTX_ALL)

# packed lane-dense output layout: [z | nll | h_z | pad]
OUT_USED = 2 * LATENT + DEC_OUT
OUT_W    = ((OUT_USED + 127) // 128) * 128
OUT_PAD  = OUT_W - OUT_USED


# ----------------------------------------------------------------- kernel ---
def vrae_iaf_kernel(
    x_ref, eps_ref,
    we1_ref, wmuls_ref, wctx_ref,            # surrogate encoder trunk + heads
    fw1_ref, fwc_ref, fw2_ref,               # fused IAF step weights
    wd1_ref, wd2_ref,                        # surrogate decoder
    b_ref,                                   # packed biases (NBIAS, BIAS_W)
    out_ref,                                 # packed (BM, OUT_W) output
    nll_scr,                                 # (BM, LATENT) f32 VMEM scratch
):
    f32 = jnp.float32
    bf16 = jnp.bfloat16

    x = x_ref[...]          # bf16 (BM, INPUT_DIM)
    eps = eps_ref[...]      # f32  (BM, LATENT)
    b = b_ref[...]          # f32  (NBIAS, BIAS_W) -- one vreg worth of biases

    # ---- encoder: x -> [mu | log_sigma], h(context) --------------------------
    # TODO(synk): original Encoder is an RNN over a PackedSequence; surrogate MLP used.
    e1 = jnp.tanh((jnp.dot(x, we1_ref[...], preferred_element_type=f32)
                   + b[_B_ENC1:_B_ENC1 + 1, :ENC_HIDDEN]).astype(bf16))

    muls = jnp.dot(e1, wmuls_ref[...], preferred_element_type=f32) \
           + b[_B_MULS:_B_MULS + 1, :LAT2]
    mu        = muls[:, :LATENT]
    log_sigma = muls[:, LATENT:]
    h_ctx = (jnp.dot(e1, wctx_ref[...], preferred_element_type=f32)
             + b[_B_CTX:_B_CTX + 1, :FLOW_CTX]).astype(bf16)

    # ---- reparameterize + per-element base log-density term (IAF.forward) ---
    z = jnp.exp(log_sigma) * eps + mu
    # base term goes straight to VMEM; the single cross-lane reduction (lz)
    # is deferred entirely to the wrapper.
    nll_scr[...] = log_sigma + 0.5 * (eps * eps) + _HALF_LOG_2PI

    # ---- loop-invariant fused context projection, all steps in one N=128 ----
    ctx_all = jnp.dot(h_ctx, fwc_ref[...], preferred_element_type=f32) \
              + b[_B_FB1:_B_FB1 + 1, :CTX_ALL]

    # ---- IAF steps: 2 serially-dependent MXU pushes per step -----------------
    # TODO(synk): AutoRegressiveNN source not given; assumed masked 2-layer
    # MADE with ReLU and additive (unmasked) context projection.
    for t in range(FLOW_DEPTH):
        ctx_t = ctx_all[:, t * FLOW_H2:(t + 1) * FLOW_H2]
        h1 = jnp.maximum(
            jnp.dot(z.astype(bf16), fw1_ref[t], preferred_element_type=f32)
            + ctx_t, 0.0)
        # block-diagonal fused second layer: ms = [m | s] (s already shifted
        # by +1.5 via the fused bias row).
        ms = jnp.dot(h1.astype(bf16), fw2_ref[t], preferred_element_type=f32) \
             + b[_B_FB2 + t:_B_FB2 + t + 1, :LAT2]
        m = ms[:, :LATENT]
        s = ms[:, LATENT:]
        sigma = jax.nn.sigmoid(s)
        z = sigma * z + (1.0 - sigma) * m
        nll_scr[...] += jnp.log(sigma + 1e-6)

    # ---- decoder: z -> [mu_x | log_sigma_x] ----------------------------------
    # TODO(synk): original Decoder consumes batch_sizes of a PackedSequence; surrogate MLP used.
    d1 = jnp.tanh((jnp.dot(z.astype(bf16), wd1_ref[...],
                           preferred_element_type=f32)
                   + b[_B_DEC1:_B_DEC1 + 1, :DEC_HIDDEN]).astype(bf16))
    h_z = jnp.dot(d1, wd2_ref[...], preferred_element_type=f32) \
          + b[_B_DEC2:_B_DEC2 + 1, :DEC_OUT]

    # ---- single lane-dense packed store: [z | nll | h_z | pad] ---------------
    pieces = [z, nll_scr[...], h_z]
    if OUT_PAD:
        pieces.append(jnp.zeros((z.shape[0], OUT_PAD), f32))
    out_ref[...] = jnp.concatenate(pieces, axis=1)


# ------------------------------------------------------------------ params --
def made_masks(in_f, hid_f):
    """Deterministic MADE masks. W1 is (in_f, hid_f), W2 is (hid_f, in_f)."""
    deg_in  = np.arange(1, in_f + 1)
    deg_hid = (np.arange(hid_f) % (in_f - 1)) + 1
    mask1 = (deg_hid[None, :] >= deg_in[:, None]).astype(np.float32)   # (in_f, hid_f)
    mask2 = (deg_in[None, :]  >  deg_hid[:, None]).astype(np.float32)  # (hid_f, in_f)
    return jnp.asarray(mask1), jnp.asarray(mask2)


def init_params(key):
    scale = 0.1
    ks = iter(jax.random.split(key, 64))
    def rnd(shape):
        return scale * jax.random.normal(next(ks), shape, dtype=jnp.float32)

    p = {}
    # surrogate encoder
    p["we1"] = rnd((INPUT_DIM, ENC_HIDDEN)); p["be1"] = rnd((1, ENC_HIDDEN))
    p["we2"] = rnd((ENC_HIDDEN, ENC_OUT));   p["be2"] = rnd((1, ENC_OUT))
    # surrogate decoder
    p["wd1"] = rnd((LATENT, DEC_HIDDEN));    p["bd1"] = rnd((1, DEC_HIDDEN))
    p["wd2"] = rnd((DEC_HIDDEN, DEC_OUT));   p["bd2"] = rnd((1, DEC_OUT))

    mask1, mask2 = made_masks(LATENT, FLOW_HIDDEN)
    for name in ("m", "s"):
        w1, wc, b1, w2, b2 = [], [], [], [], []
        for _ in range(FLOW_DEPTH):
            w1.append(rnd((LATENT, FLOW_HIDDEN)) * mask1)   # masked autoregressive layer 1
            wc.append(rnd((FLOW_CTX, FLOW_HIDDEN)))         # context projection (unmasked)
            b1.append(rnd((1, FLOW_HIDDEN)))
            w2.append(rnd((FLOW_HIDDEN, LATENT)) * mask2)   # masked autoregressive layer 2
            b2.append(rnd((1, LATENT)))
        p[f"{name}_w1"] = jnp.stack(w1)
        p[f"{name}_wc"] = jnp.stack(wc)
        p[f"{name}_b1"] = jnp.stack(b1)
        p[f"{name}_w2"] = jnp.stack(w2)
        p[f"{name}_b2"] = jnp.stack(b2)
    return p


def prepare_kernel_params(p):
    """One-time host-side fusion / dtype prep of the weights for the kernel."""
    bf16 = jnp.bfloat16
    kp = {}
    kp["we1"]   = p["we1"].astype(bf16)
    # fused mu|log_sigma head (lane-0 aligned); ctx head kept separate
    kp["wmuls"] = p["we2"][:, :LAT2].astype(bf16)
    kp["wctx"]  = p["we2"][:, LAT2:].astype(bf16)

    # fused IAF step weights: [m | s] first layer, block-diagonal second layer,
    # ctx projections for ALL steps concatenated along lanes (N = CTX_ALL).
    fw1, fw2, fwc_cols, fb1_cols, fb2 = [], [], [], [], []
    for t in range(FLOW_DEPTH):
        fw1.append(jnp.concatenate([p["m_w1"][t], p["s_w1"][t]], axis=1))
        fwc_cols.append(jnp.concatenate([p["m_wc"][t], p["s_wc"][t]], axis=1))
        fb1_cols.append(jnp.concatenate([p["m_b1"][t], p["s_b1"][t]], axis=1))
        w2 = jnp.zeros((FLOW_H2, LAT2), jnp.float32)
        w2 = w2.at[:FLOW_HIDDEN, :LATENT].set(p["m_w2"][t])
        w2 = w2.at[FLOW_HIDDEN:, LATENT:].set(p["s_w2"][t])
        fw2.append(w2)
        fb2.append(jnp.concatenate([p["m_b2"][t], p["s_b2"][t] + 1.5], axis=1))
    kp["fw1"] = jnp.stack(fw1).astype(bf16)                        # (T, 16, 64)
    kp["fwc"] = jnp.concatenate(fwc_cols, axis=1).astype(bf16)     # (8, 128)
    kp["fw2"] = jnp.stack(fw2).astype(bf16)                        # (T, 64, 32)
    kp["wd1"] = p["wd1"].astype(bf16)
    kp["wd2"] = p["wd2"].astype(bf16)

    # all f32 biases packed into one (NBIAS, BIAS_W) array (static row slices
    # inside the kernel are free)
    bias = jnp.zeros((NBIAS, BIAS_W), jnp.float32)
    bias = bias.at[_B_ENC1, :ENC_HIDDEN].set(p["be1"][0])
    bias = bias.at[_B_MULS, :LAT2].set(p["be2"][0, :LAT2])
    bias = bias.at[_B_CTX,  :FLOW_CTX].set(p["be2"][0, LAT2:])
    bias = bias.at[_B_FB1,  :CTX_ALL].set(jnp.concatenate(fb1_cols, axis=1)[0])
    for t in range(FLOW_DEPTH):
        bias = bias.at[_B_FB2 + t, :LAT2].set(fb2[t][0])
    bias = bias.at[_B_DEC1, :DEC_HIDDEN].set(p["bd1"][0])
    bias = bias.at[_B_DEC2, :DEC_OUT].set(p["bd2"][0])
    kp["bias"] = bias
    return kp


# ----------------------------------------------------------------- wrapper --
def _full2(s0, s1):
    return pl.BlockSpec((s0, s1), lambda i: (0, 0))


def _full3(s0, s1, s2):
    return pl.BlockSpec((s0, s1, s2), lambda i: (0, 0, 0))


def vrae_iaf_forward(x, eps, kp):
    B = x.shape[0]
    # Single grid step on single-TC chips / small batches; for large batches
    # split in two "parallel" blocks so v7x's second TensorCore gets used.
    G = 2 if (B >= 256 and B % 256 == 0) else 1
    BM = B // G

    inputs = (
        x.astype(jnp.bfloat16), eps,
        kp["we1"], kp["wmuls"], kp["wctx"],
        kp["fw1"], kp["fwc"], kp["fw2"],
        kp["wd1"], kp["wd2"],
        kp["bias"],
    )

    in_specs = [
        pl.BlockSpec((BM, INPUT_DIM), lambda i: (i, 0)),   # x
        pl.BlockSpec((BM, LATENT),    lambda i: (i, 0)),   # eps
        _full2(INPUT_DIM, ENC_HIDDEN),                     # we1
        _full2(ENC_HIDDEN, LAT2),                          # wmuls (mu|log_sigma)
        _full2(ENC_HIDDEN, FLOW_CTX),                      # wctx
        _full3(FLOW_DEPTH, LATENT, FLOW_H2),               # fw1
        _full2(FLOW_CTX, CTX_ALL),                         # fused ctx projection
        _full3(FLOW_DEPTH, FLOW_H2, LAT2),                 # fw2 (block-diag)
        _full2(LATENT, DEC_HIDDEN),                        # wd1
        _full2(DEC_HIDDEN, DEC_OUT),                       # wd2
        _full2(NBIAS, BIAS_W),                             # packed biases
    ]

    out_specs = pl.BlockSpec((BM, OUT_W), lambda i: (i, 0))
    out_shape = jax.ShapeDtypeStruct((B, OUT_W), jnp.float32)

    packed = pl.pallas_call(
        vrae_iaf_kernel,
        grid=(G,),
        in_specs=in_specs,
        out_specs=out_specs,
        out_shape=out_shape,
        scratch_shapes=[pltpu.VMEM((BM, LATENT), jnp.float32)],
        compiler_params=pltpu.CompilerParams(
            dimension_semantics=("parallel",)),
    )(*inputs)

    # free XLA slices of the single packed lane-dense output tile
    z   = packed[:, :LATENT]
    nll = packed[:, LATENT:2 * LATENT]
    h_z = packed[:, 2 * LATENT:2 * LATENT + DEC_OUT]

    # deferred single reduction for lz (kept off the kernel's serial chain)
    lz = -jnp.sum(nll)
    px_mu = h_z[:, :OUTPUT_DIM]
    px_ls = h_z[:, OUTPUT_DIM:]

    # prior p(z): zeros buffer expanded to batch (trivial glue, outside kernel)
    pz_mu = jnp.zeros((B, LATENT), jnp.float32)
    pz_ls = jnp.zeros((B, LATENT), jnp.float32)
    return {"px": (px_mu, px_ls), "pz": (pz_mu, pz_ls), "z": z, "lz": lz}


# ------------------------------------------------------------- pure-JAX ref -
def reference_forward(x, eps, p):
    e1 = jnp.tanh(x @ p["we1"] + p["be1"])
    h_x = e1 @ p["we2"] + p["be2"]
    mu, log_sigma = h_x[:, :LATENT], h_x[:, LATENT:2 * LATENT]
    h = h_x[:, 2 * LATENT:]
    z = jnp.exp(log_sigma) * eps + mu
    l = -jnp.sum(log_sigma + 0.5 * eps ** 2 + 0.5 * math.log(2 * math.pi))
    for t in range(FLOW_DEPTH):
        hm = jax.nn.relu(z @ p["m_w1"][t] + h @ p["m_wc"][t] + p["m_b1"][t])
        m = hm @ p["m_w2"][t] + p["m_b2"][t]
        hs = jax.nn.relu(z @ p["s_w1"][t] + h @ p["s_wc"][t] + p["s_b1"][t])
        s = hs @ p["s_w2"][t] + p["s_b2"][t] + 1.5
        sigma = jax.nn.sigmoid(s)
        z = sigma * z + (1 - sigma) * m
        l = l - jnp.sum(jnp.log(sigma + 1e-6))
    d1 = jnp.tanh(z @ p["wd1"] + p["bd1"])
    h_z = d1 @ p["wd2"] + p["bd2"]
    return z, l, h_z[:, :OUTPUT_DIM], h_z[:, OUTPUT_DIM:]


# -------------------------------------------------------------------- main --
if __name__ == "__main__":
    key = jax.random.PRNGKey(0)
    k_x, k_eps, k_p = jax.random.split(key, 3)

    x   = jax.random.normal(k_x,   (BATCH, INPUT_DIM), dtype=jnp.float32)
    # eps sampled host-side for determinism (torch .normal_() inside IAF.forward)
    eps = jax.random.normal(k_eps, (BATCH, LATENT),    dtype=jnp.float32)
    params  = init_params(k_p)
    kparams = prepare_kernel_params(params)

    out = jax.jit(vrae_iaf_forward)(x, eps, kparams)
    jax.block_until_ready(out)

    # correctness check against pure-f32 JAX reference; tolerances relaxed to
    # account for bf16 matmul operands / bf16 tanh (f32 accumulation) in kernel.
    z_ref, l_ref, pxmu_ref, pxls_ref = reference_forward(x, eps, params)
    np.testing.assert_allclose(out["z"],     z_ref,    rtol=3e-2, atol=3e-2)
    np.testing.assert_allclose(out["lz"],    l_ref,    rtol=3e-2, atol=3e-2)
    np.testing.assert_allclose(out["px"][0], pxmu_ref, rtol=3e-2, atol=3e-2)
    np.testing.assert_allclose(out["px"][1], pxls_ref, rtol=3e-2, atol=3e-2)

    print("KERNEL_OK")
</pallas_src>

<mosaic_0001>
module attributes {stable_mosaic.version = 11 : i64} {
  func.func @vrae_iaf_kernel(%arg0: i32, %arg1: memref<64x32xbf16, #tpu.memory_space<vmem>>, %arg2: memref<64x16xf32, #tpu.memory_space<vmem>>, %arg3: memref<32x32xbf16, #tpu.memory_space<vmem>>, %arg4: memref<32x32xbf16, #tpu.memory_space<vmem>>, %arg5: memref<32x8xbf16, #tpu.memory_space<vmem>>, %arg6: memref<2x16x64xbf16, #tpu.memory_space<vmem>>, %arg7: memref<8x128xbf16, #tpu.memory_space<vmem>>, %arg8: memref<2x64x32xbf16, #tpu.memory_space<vmem>>, %arg9: memref<16x32xbf16, #tpu.memory_space<vmem>>, %arg10: memref<32x64xbf16, #tpu.memory_space<vmem>>, %arg11: memref<8x128xf32, #tpu.memory_space<vmem>>, %arg12: memref<64x128xf32, #tpu.memory_space<vmem>>, %arg13: memref<64x16xf32, #tpu.memory_space<vmem>>) attributes {dimension_semantics = [#tpu.dimension_semantics<parallel>], iteration_bounds = array<i64: 1>, scalar_prefetch = 0 : i64, scratch_operands = 1 : i64, tpu.core_type = #tpu.core_type<tc>, window_params = [{transform_indices = @transform_0, window_bounds = array<i64: 64, 32>}, {transform_indices = @transform_1, window_bounds = array<i64: 64, 16>}, {pipeline_mode = #tpu.pipeline_mode<synchronous>, transform_indices = @transform_2, window_bounds = array<i64: 32, 32>}, {pipeline_mode = #tpu.pipeline_mode<synchronous>, transform_indices = @transform_3, window_bounds = array<i64: 32, 32>}, {pipeline_mode = #tpu.pipeline_mode<synchronous>, transform_indices = @transform_4, window_bounds = array<i64: 32, 8>}, {pipeline_mode = #tpu.pipeline_mode<synchronous>, transform_indices = @transform_5, window_bounds = array<i64: 2, 16, 64>}, {pipeline_mode = #tpu.pipeline_mode<synchronous>, transform_indices = @transform_6, window_bounds = array<i64: 8, 128>}, {pipeline_mode = #tpu.pipeline_mode<synchronous>, transform_indices = @transform_7, window_bounds = array<i64: 2, 64, 32>}, {pipeline_mode = #tpu.pipeline_mode<synchronous>, transform_indices = @transform_8, window_bounds = array<i64: 16, 32>}, {pipeline_mode = #tpu.pipeline_mode<synchronous>, transform_indices = @transform_9, window_bounds = array<i64: 32, 64>}, {pipeline_mode = #tpu.pipeline_mode<synchronous>, transform_indices = @transform_10, window_bounds = array<i64: 8, 128>}, {transform_indices = @transform_11, window_bounds = array<i64: 64, 128>}]} {
    %c0 = arith.constant 0 : index
    %c0_0 = arith.constant 0 : index
    %0 = vector.load %arg1[%c0, %c0_0] : memref<64x32xbf16, #tpu.memory_space<vmem>>, vector<64x32xbf16>
    %c0_1 = arith.constant 0 : index
    %c0_2 = arith.constant 0 : index
    %1 = vector.load %arg2[%c0_1, %c0_2] : memref<64x16xf32, #tpu.memory_space<vmem>>, vector<64x16xf32>
    %c0_3 = arith.constant 0 : index
    %c0_4 = arith.constant 0 : index
    %2 = vector.load %arg11[%c0_3, %c0_4] : memref<8x128xf32, #tpu.memory_space<vmem>>, vector<8x128xf32>
    %c0_5 = arith.constant 0 : index
    %c0_6 = arith.constant 0 : index
    %3 = vector.load %arg3[%c0_5, %c0_6] : memref<32x32xbf16, #tpu.memory_space<vmem>>, vector<32x32xbf16>
    %cst = arith.constant dense<0.000000e+00> : vector<64x32xf32>
    %4 = tpu.matmul %0, %3, %cst {dimension_numbers = #tpu.dot_dimension_numbers<[1], [0], [0], [1], [0, 0, 1, 1], [], []>} : vector<64x32xbf16>, vector<32x32xbf16>, vector<64x32xf32> -> vector<64x32xf32>
    %5 = vector.extract_strided_slice %2 {offsets = [0, 0], sizes = [1, 32], strides = [1, 1]} : vector<8x128xf32> to vector<1x32xf32>
    %6 = vector.broadcast %5 : vector<1x32xf32> to vector<64x32xf32>
    %7 = arith.addf %4, %6 : vector<64x32xf32>
    %8 = arith.truncf %7 : vector<64x32xf32> to vector<64x32xbf16>
    %9 = math.tanh %8 : vector<64x32xbf16>
    %c0_7 = arith.constant 0 : index
    %c0_8 = arith.constant 0 : index
    %10 = vector.load %arg4[%c0_7, %c0_8] : memref<32x32xbf16, #tpu.memory_space<vmem>>, vector<32x32xbf16>
    %cst_9 = arith.constant dense<0.000000e+00> : vector<64x32xf32>
    %11 = tpu.matmul %9, %10, %cst_9 {dimension_numbers = #tpu.dot_dimension_numbers<[1], [0], [0], [1], [0, 0, 1, 1], [], []>} : vector<64x32xbf16>, vector<32x32xbf16>, vector<64x32xf32> -> vector<64x32xf32>
    %12 = vector.extract_strided_slice %2 {offsets = [1, 0], sizes = [1, 32], strides = [1, 1]} : vector<8x128xf32> to vector<1x32xf32>
    %13 = vector.broadcast %12 : vector<1x32xf32> to vector<64x32xf32>
    %14 = arith.addf %11, %13 : vector<64x32xf32>
    %15 = vector.extract_strided_slice %14 {offsets = [0, 0], sizes = [64, 16], strides = [1, 1]} : vector<64x32xf32> to vector<64x16xf32>
    %16 = vector.extract_strided_slice %14 {offsets = [0, 16], sizes = [64, 16], strides = [1, 1]} : vector<64x32xf32> to vector<64x16xf32>
    %c0_10 = arith.constant 0 : index
    %c0_11 = arith.constant 0 : index
    %17 = vector.load %arg5[%c0_10, %c0_11] : memref<32x8xbf16, #tpu.memory_space<vmem>>, vector<32x8xbf16>
    %cst_12 = arith.constant dense<0.000000e+00> : vector<64x8xf32>
    %18 = tpu.matmul %9, %17, %cst_12 {dimension_numbers = #tpu.dot_dimension_numbers<[1], [0], [0], [1], [0, 0, 1, 1], [], []>} : vector<64x32xbf16>, vector<32x8xbf16>, vector<64x8xf32> -> vector<64x8xf32>
    %19 = vector.extract_strided_slice %2 {offsets = [2, 0], sizes = [1, 8], strides = [1, 1]} : vector<8x128xf32> to vector<1x8xf32>
    %20 = vector.broadcast %19 : vector<1x8xf32> to vector<64x8xf32>
    %21 = arith.addf %18, %20 : vector<64x8xf32>
    %22 = arith.truncf %21 : vector<64x8xf32> to vector<64x8xbf16>
    %23 = math.exp %16 : vector<64x16xf32>
    %24 = arith.mulf %23, %1 : vector<64x16xf32>
    %25 = arith.addf %24, %15 : vector<64x16xf32>
    %26 = arith.mulf %1, %1 : vector<64x16xf32>
    %cst_13 = arith.constant 5.000000e-01 : f32
    %27 = vector.broadcast %cst_13 : f32 to vector<64x16xf32>
    %28 = arith.mulf %27, %26 : vector<64x16xf32>
    %29 = arith.addf %16, %28 : vector<64x16xf32>
    %cst_14 = arith.constant 0.918938517 : f32
    %30 = vector.broadcast %cst_14 : f32 to vector<64x16xf32>
    %31 = arith.addf %29, %30 : vector<64x16xf32>
    %c0_15 = arith.constant 0 : index
    %c0_16 = arith.constant 0 : index
    %32 = vector.load %arg13[%c0_15, %c0_16] : memref<64x16xf32, #tpu.memory_space<vmem>>, vector<64x16xf32>
    tpu.vector_store %arg13[%c0_15, %c0_16], %31 {strides = array<i32>} : memref<64x16xf32, #tpu.memory_space<vmem>>, vector<64x16xf32>,
    %c0_17 = arith.constant 0 : index
    %c0_18 = arith.constant 0 : index
    %33 = vector.load %arg7[%c0_17, %c0_18] : memref<8x128xbf16, #tpu.memory_space<vmem>>, vector<8x128xbf16>
    %cst_19 = arith.constant dense<0.000000e+00> : vector<64x128xf32>
    %34 = tpu.matmul %22, %33, %cst_19 {dimension_numbers = #tpu.dot_dimension_numbers<[1], [0], [0], [1], [0, 0, 1, 1], [], []>} : vector<64x8xbf16>, vector<8x128xbf16>, vector<64x128xf32> -> vector<64x128xf32>
    %35 = vector.extract_strided_slice %2 {offsets = [3, 0], sizes = [1, 128], strides = [1, 1]} : vector<8x128xf32> to vector<1x128xf32>
    %36 = vector.broadcast %35 : vector<1x128xf32> to vector<64x128xf32>
    %37 = arith.addf %34, %36 : vector<64x128xf32>
    %38 = vector.extract_strided_slice %37 {offsets = [0, 0], sizes = [64, 64], strides = [1, 1]} : vector<64x128xf32> to vector<64x64xf32>
    %39 = arith.truncf %25 : vector<64x16xf32> to vector<64x16xbf16>
    %c0_20 = arith.constant 0 : index
    %c0_21 = arith.constant 0 : index
    %c0_22 = arith.constant 0 : index
    %40 = vector.load %arg6[%c0_20, %c0_21, %c0_22] : memref<2x16x64xbf16, #tpu.memory_space<vmem>>, vector<1x16x64xbf16>
    %41 = vector.shape_cast %40 : vector<1x16x64xbf16> to vector<16x64xbf16>
    %cst_23 = arith.constant dense<0.000000e+00> : vector<64x64xf32>
    %42 = tpu.matmul %39, %41, %cst_23 {dimension_numbers = #tpu.dot_dimension_numbers<[1], [0], [0], [1], [0, 0, 1, 1], [], []>} : vector<64x16xbf16>, vector<16x64xbf16>, vector<64x64xf32> -> vector<64x64xf32>
    %43 = arith.addf %42, %38 : vector<64x64xf32>
    %cst_24 = arith.constant 0.000000e+00 : f32
    %44 = vector.broadcast %cst_24 : f32 to vector<64x64xf32>
    %45 = arith.maximumf %43, %44 : vector<64x64xf32>
    %46 = arith.truncf %45 : vector<64x64xf32> to vector<64x64xbf16>
    %c0_25 = arith.constant 0 : index
    %c0_26 = arith.constant 0 : index
    %c0_27 = arith.constant 0 : index
    %47 = vector.load %arg8[%c0_25, %c0_26, %c0_27] : memref<2x64x32xbf16, #tpu.memory_space<vmem>>, vector<1x64x32xbf16>
    %48 = vector.shape_cast %47 : vector<1x64x32xbf16> to vector<64x32xbf16>
    %cst_28 = arith.constant dense<0.000000e+00> : vector<64x32xf32>
    %49 = tpu.matmul %46, %48, %cst_28 {dimension_numbers = #tpu.dot_dimension_numbers<[1], [0], [0], [1], [0, 0, 1, 1], [], []>} : vector<64x64xbf16>, vector<64x32xbf16>, vector<64x32xf32> -> vector<64x32xf32>
    %50 = vector.extract_strided_slice %2 {offsets = [4, 0], sizes = [1, 32], strides = [1, 1]} : vector<8x128xf32> to vector<1x32xf32>
    %51 = vector.broadcast %50 : vector<1x32xf32> to vector<64x32xf32>
    %52 = arith.addf %49, %51 : vector<64x32xf32>
    %53 = vector.extract_strided_slice %52 {offsets = [0, 0], sizes = [64, 16], strides = [1, 1]} : vector<64x32xf32> to vector<64x16xf32>
    %54 = vector.extract_strided_slice %52 {offsets = [0, 16], sizes = [64, 16], strides = [1, 1]} : vector<64x32xf32> to vector<64x16xf32>
    %55 = arith.negf %54 : vector<64x16xf32>
    %56 = math.exp %55 : vector<64x16xf32>
    %cst_29 = arith.constant 1.000000e+00 : f32
    %57 = vector.broadcast %cst_29 : f32 to vector<64x16xf32>
    %58 = arith.addf %57, %56 : vector<64x16xf32>
    %59 = arith.divf %57, %58 : vector<64x16xf32>
    %60 = arith.mulf %59, %25 : vector<64x16xf32>
    %cst_30 = arith.constant 1.000000e+00 : f32
    %61 = vector.broadcast %cst_30 : f32 to vector<64x16xf32>
    %62 = arith.subf %61, %59 : vector<64x16xf32>
    %63 = arith.mulf %62, %53 : vector<64x16xf32>
    %64 = arith.addf %60, %63 : vector<64x16xf32>
    %c0_31 = arith.constant 0 : index
    %c0_32 = arith.constant 0 : index
    %65 = vector.load %arg13[%c0_31, %c0_32] : memref<64x16xf32, #tpu.memory_space<vmem>>, vector<64x16xf32>
    %cst_33 = arith.constant 9.99999997E-7 : f32
    %66 = vector.broadcast %cst_33 : f32 to vector<64x16xf32>
    %67 = arith.addf %59, %66 : vector<64x16xf32>
    %68 = math.log %67 : vector<64x16xf32>
    %69 = arith.addf %65, %68 : vector<64x16xf32>
    %c0_34 = arith.constant 0 : index
    %c0_35 = arith.constant 0 : index
    %70 = vector.load %arg13[%c0_34, %c0_35] : memref<64x16xf32, #tpu.memory_space<vmem>>, vector<64x16xf32>
    tpu.vector_store %arg13[%c0_34, %c0_35], %69 {strides = array<i32>} : memref<64x16xf32, #tpu.memory_space<vmem>>, vector<64x16xf32>,
    %71 = vector.extract_strided_slice %37 {offsets = [0, 64], sizes = [64, 64], strides = [1, 1]} : vector<64x128xf32> to vector<64x64xf32>
    %72 = arith.truncf %64 : vector<64x16xf32> to vector<64x16xbf16>
    %c1 = arith.constant 1 : index
    %c0_36 = arith.constant 0 : index
    %c0_37 = arith.constant 0 : index
    %73 = vector.load %arg6[%c1, %c0_36, %c0_37] : memref<2x16x64xbf16, #tpu.memory_space<vmem>>, vector<1x16x64xbf16>
    %74 = vector.shape_cast %73 : vector<1x16x64xbf16> to vector<16x64xbf16>
    %cst_38 = arith.constant dense<0.000000e+00> : vector<64x64xf32>
    %75 = tpu.matmul %72, %74, %cst_38 {dimension_numbers = #tpu.dot_dimension_numbers<[1], [0], [0], [1], [0, 0, 1, 1], [], []>} : vector<64x16xbf16>, vector<16x64xbf16>, vector<64x64xf32> -> vector<64x64xf32>
    %76 = arith.addf %75, %71 : vector<64x64xf32>
    %cst_39 = arith.constant 0.000000e+00 : f32
    %77 = vector.broadcast %cst_39 : f32 to vector<64x64xf32>
    %78 = arith.maximumf %76, %77 : vector<64x64xf32>
    %79 = arith.truncf %78 : vector<64x64xf32> to vector<64x64xbf16>
    %c1_40 = arith.constant 1 : index
    %c0_41 = arith.constant 0 : index
    %c0_42 = arith.constant 0 : index
    %80 = vector.load %arg8[%c1_40, %c0_41, %c0_42] : memref<2x64x32xbf16, #tpu.memory_space<vmem>>, vector<1x64x32xbf16>
    %81 = vector.shape_cast %80 : vector<1x64x32xbf16> to vector<64x32xbf16>
    %cst_43 = arith.constant dense<0.000000e+00> : vector<64x32xf32>
    %82 = tpu.matmul %79, %81, %cst_43 {dimension_numbers = #tpu.dot_dimension_numbers<[1], [0], [0], [1], [0, 0, 1, 1], [], []>} : vector<64x64xbf16>, vector<64x32xbf16>, vector<64x32xf32> -> vector<64x32xf32>
    %83 = vector.extract_strided_slice %2 {offsets = [5, 0], sizes = [1, 32], strides = [1, 1]} : vector<8x128xf32> to vector<1x32xf32>
    %84 = vector.broadcast %83 : vector<1x32xf32> to vector<64x32xf32>
    %85 = arith.addf %82, %84 : vector<64x32xf32>
    %86 = vector.extract_strided_slice %85 {offsets = [0, 0], sizes = [64, 16], strides = [1, 1]} : vector<64x32xf32> to vector<64x16xf32>
    %87 = vector.extract_strided_slice %85 {offsets = [0, 16], sizes = [64, 16], strides = [1, 1]} : vector<64x32xf32> to vector<64x16xf32>
    %88 = arith.negf %87 : vector<64x16xf32>
    %89 = math.exp %88 : vector<64x16xf32>
    %cst_44 = arith.constant 1.000000e+00 : f32
    %90 = vector.broadcast %cst_44 : f32 to vector<64x16xf32>
    %91 = arith.addf %90, %89 : vector<64x16xf32>
    %92 = arith.divf %90, %91 : vector<64x16xf32>
    %93 = arith.mulf %92, %64 : vector<64x16xf32>
    %cst_45 = arith.constant 1.000000e+00 : f32
    %94 = vector.broadcast %cst_45 : f32 to vector<64x16xf32>
    %95 = arith.subf %94, %92 : vector<64x16xf32>
    %96 = arith.mulf %95, %86 : vector<64x16xf32>
    %97 = arith.addf %93, %96 : vector<64x16xf32>
    %c0_46 = arith.constant 0 : index
    %c0_47 = arith.constant 0 : index
    %98 = vector.load %arg13[%c0_46, %c0_47] : memref<64x16xf32, #tpu.memory_space<vmem>>, vector<64x16xf32>
    %cst_48 = arith.constant 9.99999997E-7 : f32
    %99 = vector.broadcast %cst_48 : f32 to vector<64x16xf32>
    %100 = arith.addf %92, %99 : vector<64x16xf32>
    %101 = math.log %100 : vector<64x16xf32>
    %102 = arith.addf %98, %101 : vector<64x16xf32>
    %c0_49 = arith.constant 0 : index
    %c0_50 = arith.constant 0 : index
    %103 = vector.load %arg13[%c0_49, %c0_50] : memref<64x16xf32, #tpu.memory_space<vmem>>, vector<64x16xf32>
    tpu.vector_store %arg13[%c0_49, %c0_50], %102 {strides = array<i32>} : memref<64x16xf32, #tpu.memory_space<vmem>>, vector<64x16xf32>,
    %104 = arith.truncf %97 : vector<64x16xf32> to vector<64x16xbf16>
    %c0_51 = arith.constant 0 : index
    %c0_52 = arith.constant 0 : index
    %105 = vector.load %arg9[%c0_51, %c0_52] : memref<16x32xbf16, #tpu.memory_space<vmem>>, vector<16x32xbf16>
    %cst_53 = arith.constant dense<0.000000e+00> : vector<64x32xf32>
    %106 = tpu.matmul %104, %105, %cst_53 {dimension_numbers = #tpu.dot_dimension_numbers<[1], [0], [0], [1], [0, 0, 1, 1], [], []>} : vector<64x16xbf16>, vector<16x32xbf16>, vector<64x32xf32> -> vector<64x32xf32>
    %107 = vector.extract_strided_slice %2 {offsets = [6, 0], sizes = [1, 32], strides = [1, 1]} : vector<8x128xf32> to vector<1x32xf32>
    %108 = vector.broadcast %107 : vector<1x32xf32> to vector<64x32xf32>
    %109 = arith.addf %106, %108 : vector<64x32xf32>
    %110 = arith.truncf %109 : vector<64x32xf32> to vector<64x32xbf16>
    %111 = math.tanh %110 : vector<64x32xbf16>
    %c0_54 = arith.constant 0 : index
    %c0_55 = arith.constant 0 : index
    %112 = vector.load %arg10[%c0_54, %c0_55] : memref<32x64xbf16, #tpu.memory_space<vmem>>, vector<32x64xbf16>
    %cst_56 = arith.constant dense<0.000000e+00> : vector<64x64xf32>
    %113 = tpu.matmul %111, %112, %cst_56 {dimension_numbers = #tpu.dot_dimension_numbers<[1], [0], [0], [1], [0, 0, 1, 1], [], []>} : vector<64x32xbf16>, vector<32x64xbf16>, vector<64x64xf32> -> vector<64x64xf32>
    %114 = vector.extract_strided_slice %2 {offsets = [7, 0], sizes = [1, 64], strides = [1, 1]} : vector<8x128xf32> to vector<1x64xf32>
    %115 = vector.broadcast %114 : vector<1x64xf32> to vector<64x64xf32>
    %116 = arith.addf %113, %115 : vector<64x64xf32>
    %c0_57 = arith.constant 0 : index
    %c0_58 = arith.constant 0 : index
    %117 = vector.load %arg13[%c0_57, %c0_58] : memref<64x16xf32, #tpu.memory_space<vmem>>, vector<64x16xf32>
    %cst_59 = arith.constant 0.000000e+00 : f32
    %118 = vector.broadcast %cst_59 : f32 to vector<64x32xf32>
    %119 = tpu.concatenate %97, %117, %116, %118 in 1 : vector<64x16xf32>, vector<64x16xf32>, vector<64x64xf32>, vector<64x32xf32> -> vector<64x128xf32>
    %c0_60 = arith.constant 0 : index
    %c0_61 = arith.constant 0 : index
    %120 = vector.load %arg12[%c0_60, %c0_61] : memref<64x128xf32, #tpu.memory_space<vmem>>, vector<64x128xf32>
    tpu.vector_store %arg12[%c0_60, %c0_61], %119 {strides = array<i32>} : memref<64x128xf32, #tpu.memory_space<vmem>>, vector<64x128xf32>,
    return
  }
  func.func @transform_0(%arg0: i32) -> (i32, i32) {
    %c0_i32 = arith.constant 0 : i32
    %c0_i32_0 = arith.constant 0 : i32
    return %arg0, %c0_i32 : i32, i32
  }
  func.func @transform_1(%arg0: i32) -> (i32, i32) {
    %c0_i32 = arith.constant 0 : i32
    %c0_i32_0 = arith.constant 0 : i32
    return %arg0, %c0_i32 : i32, i32
  }
  func.func @transform_2(%arg0: i32) -> (i32, i32) {
    %c0_i32 = arith.constant 0 : i32
    %c0_i32_0 = arith.constant 0 : i32
    %c0_i32_1 = arith.constant 0 : i32
    return %c0_i32, %c0_i32_0 : i32, i32
  }
  func.func @transform_3(%arg0: i32) -> (i32, i32) {
    %c0_i32 = arith.constant 0 : i32
    %c0_i32_0 = arith.constant 0 : i32
    %c0_i32_1 = arith.constant 0 : i32
    return %c0_i32, %c0_i32_0 : i32, i32
  }
  func.func @transform_4(%arg0: i32) -> (i32, i32) {
    %c0_i32 = arith.constant 0 : i32
    %c0_i32_0 = arith.constant 0 : i32
    %c0_i32_1 = arith.constant 0 : i32
    return %c0_i32, %c0_i32_0 : i32, i32
  }
  func.func @transform_5(%arg0: i32) -> (i32, i32, i32) {
    %c0_i32 = arith.constant 0 : i32
    %c0_i32_0 = arith.constant 0 : i32
    %c0_i32_1 = arith.constant 0 : i32
    %c0_i32_2 = arith.constant 0 : i32
    return %c0_i32, %c0_i32_0, %c0_i32_1 : i32, i32, i32
  }
  func.func @transform_6(%arg0: i32) -> (i32, i32) {
    %c0_i32 = arith.constant 0 : i32
    %c0_i32_0 = arith.constant 0 : i32
    %c0_i32_1 = arith.constant 0 : i32
    return %c0_i32, %c0_i32_0 : i32, i32
  }
  func.func @transform_7(%arg0: i32) -> (i32, i32, i32) {
    %c0_i32 = arith.constant 0 : i32
    %c0_i32_0 = arith.constant 0 : i32
    %c0_i32_1 = arith.constant 0 : i32
    %c0_i32_2 = arith.constant 0 : i32
    return %c0_i32, %c0_i32_0, %c0_i32_1 : i32, i32, i32
  }
  func.func @transform_8(%arg0: i32) -> (i32, i32) {
    %c0_i32 = arith.constant 0 : i32
    %c0_i32_0 = arith.constant 0 : i32
    %c0_i32_1 = arith.constant 0 : i32
    return %c0_i32, %c0_i32_0 : i32, i32
  }
  func.func @transform_9(%arg0: i32) -> (i32, i32) {
    %c0_i32 = arith.constant 0 : i32
    %c0_i32_0 = arith.constant 0 : i32
    %c0_i32_1 = arith.constant 0 : i32
    return %c0_i32, %c0_i32_0 : i32, i32
  }
  func.func @transform_10(%arg0: i32) -> (i32, i32) {
    %c0_i32 = arith.constant 0 : i32
    %c0_i32_0 = arith.constant 0 : i32
    %c0_i32_1 = arith.constant 0 : i32
    return %c0_i32, %c0_i32_0 : i32, i32
  }
  func.func @transform_11(%arg0: i32) -> (i32, i32) {
    %c0_i32 = arith.constant 0 : i32
    %c0_i32_0 = arith.constant 0 : i32
    return %arg0, %c0_i32 : i32, i32
  }
}

</mosaic_0001>

<bundles_post_ra>
// kernel: vrae_iaf_forward.1
= control target key start
LH: loop header
LB: loop body
LE: loop exit
PB: predicated region body
PF: predicated region fallthrough
CT: control target
= control target key end

     0   :  { %vm96_vm0 = vcmask 261120   ;;  %s2312_s20 = smov 16   ;;  %v60_v16 = vlaneseq  ;;  %vm587_vm1 = vcmask 1043456   ;;  %vm574_vm2 = vcmask 64512   ;;  %s2972_s2 = inlined_call_operand.vmem [shape: bf16[32,32], index: 2, kind: input, shape index: {}]   ;;  %s2973_s0 = inlined_call_operand.vmem [shape: bf16[64,32], index: 0, kind: input, shape index: {}]   ;;  %s2974_s3 = inlined_call_operand.vmem [shape: bf16[32,32], index: 3, kind: input, shape index: {}]   ;;  %s2975_s4 = inlined_call_operand.vmem [shape: bf16[32,8], index: 4, kind: input, shape index: {}]   ;;  %s2976_s1 = inlined_call_operand.vmem [shape: f32[64,16], index: 1, kind: input, shape index: {}]   ;;  %s2977_s10 = inlined_call_operand.vmem [shape: f32[8,128], index: 10, kind: input, shape index: {}]   ;;  %s2978_s6 = inlined_call_operand.vmem [shape: bf16[8,128], index: 6, kind: input, shape index: {}]   ;;  %s2979_s5 = inlined_call_operand.vmem [shape: bf16[2,16,64], index: 5, kind: input, shape index: {}]   ;;  %s2980_s7 = inlined_call_operand.vmem [shape: bf16[2,64,32], index: 7, kind: input, shape index: {}]   ;;  %s2981_s8 = inlined_call_operand.vmem [shape: bf16[16,32], index: 8, kind: input, shape index: {}]   ;;  %s2982_s9 = inlined_call_operand.vmem [shape: bf16[32,64], index: 9, kind: input, shape index: {}]   ;;  %s2983_s11 = inlined_call_operand.vmem [shape: f32[64,128], index: 11, kind: output, shape index: {}]  }
   0x1   :  { %v2152_v0 = vld [vmem:[%s2972_s2] sm:$0xff]   ;;  %v2153_v1 = vld [vmem:[%s2972_s2 + $0x8] sm:$0xff]   ;;  %v2156_v4 = vld [vmem:[%s2973_s0 + $0x10] sm:$0xff]   ;;  %vm560_vm3 = vcmask 130048   ;;  %vm805_vm4 = vcmask 523264   ;;  %vm1857_vm5 = vcmask 785408  }
   0x2   :  { %2027 = vmatprep.subr.bf16.mxu0 %v2152_v0  ;;  %v2154_v2 = vld [vmem:[%s2973_s0] sm:$0xff]   ;;  %v2155_v3 = vld [vmem:[%s2973_s0 + $0x8] sm:$0xff]   ;;  %v2157_v5 = vld [vmem:[%s2973_s0 + $0x18] sm:$0xff]   ;;  %v2434_v17 = vshrl.u32 %v60_v16, 7  ;;  %s2313_s0 = smov 112  }
   0x3   :  { %2028 = vmatpush3.bf16.msra.mxu0 %v2152_v0  ;;  %2031 = vmatprep.mubr.msk.bf16.mxu0 %vm96_vm0, %v2154_v2  ;;  %v2158_v6 = vld [vmem:[%s2974_s3] sm:$0xff]   ;;  %v2160_v8 = vld [vmem:[%s2974_s3 + $0x8] sm:$0xff]   ;;  %v49_v10 = vld [vmem:[%s2976_s1 + $0x10] sm:$0xff] }
   0x4   :  { %2029 = vmatprep.subr.bf16.mxu0 %v2153_v1  ;;  %v2159_v7 = vld [vmem:[%s2975_s4] sm:$0xff]   ;;  %2039 = vmatprep.subr.bf16.mxu1 %v2158_v6  ;;  %v2161_v9 = vld [vmem:[%s2975_s4 + $0x8] sm:$0xff]   ;;  %v50_v12 = vld [vmem:[%s2976_s1 + $0x18] sm:$0xff]  ;;  %v62_v18 = vsub.s32 0, %v2434_v17  ;;  %v188_v47 = vsub.s32 1, %v2434_v17  ;;  %v285_v48 = vsub.s32 2, %v2434_v17 }
   0x5   :  { %2040 = vmatpush3.bf16.msra.mxu1 %v2158_v6  ;;  %v47_v11 = vld [vmem:[%s2976_s1] sm:$0xff]  ;;  %396 = vrot.lane.b32.xlu1 %v49_v10, %s2312_s20  ;;  %v48_v13 = vld [vmem:[%s2976_s1 + $0x8] sm:$0xff] }
   0x6   :  { %2041 = vmatprep.subr.bf16.mxu1 %v2160_v8  ;;  %392 = vrot.lane.b32.xlu0 %v47_v11, %s2312_s20  ;;  %v51_v14 = vld [vmem:[%s2976_s1 + $0x20] sm:$0xff]  ;;  %v52_v15 = vld [vmem:[%s2976_s1 + $0x28] sm:$0xff] }
   0x7   :  { %2030 = vmatpush3.bf16.msra.mxu0 %v2153_v1  ;;  %v2440_v19 = vld [vmem:[%s2977_s10] sm:$0xff] }
   0x8   :  { %2051 = vmatprep.subr.bf16.mxu0 %v2159_v7  ;;  %v63_v20 = vrot.slane %v2440_v19, %v62_v18  ;;  %v569_v45 = vld [vmem:[%s2978_s6] sm:$0xf]  ;;  %v189_v49 = vrot.slane %v2440_v19, %v188_v47  ;;  %v286_v50 = vrot.slane %v2440_v19, %v285_v48 }
   0x9   :  { %2042 = vmatpush3.bf16.msra.mxu1 %v2160_v8  ;;  %398 = vrot.lane.b32.xlu1 %v50_v12, %s2312_s20  ;;  %v589_v46 = vsel %vm587_vm1, %v569_v45, 0  ;;  %v54_v12 = vld [vmem:[%s2976_s1 + $0x38] sm:$0xff] }
   0xa   :  { %2032 = vmatmul.mubr.msk.bf16.vlgmr.msra.gmra.mrb[0].mxu0 %vm96_vm0, %v2155_v3  ;;  %394 = vrot.lane.b32.xlu0 %v48_v13, %s2312_s20 }
   0xb   :  { %2035 = vmatprep.mubr.msk.bf16.mxu0 %vm96_vm0, %v2156_v4  ;;  %2052 = vmatpush3.bf16.msra.mxu0 %v2159_v7  ;;  %v53_v7 = vld [vmem:[%s2976_s1 + $0x30] sm:$0xff] }
   0xc   :  { %2053 = vmatprep.subr.bf16.mxu0 %v2161_v9  ;;  %2147 = vmatprep.subr.msk.bf16.mxu1 %vm587_vm1, %v569_v45 }
   0xd   :  { %402 = vrot.lane.b32.xlu1 %v52_v15, %s2312_s20 }
   0xe   :  { %400 = vrot.lane.b32.xlu0 %v51_v14, %s2312_s20 }
   0xf   :  { %2054 = vmatpush3.bf16.msra.mxu0 %v2161_v9 }
  0x12   :  { %2036 = vmatmul.mubr.msk.bf16.gmra.mrb[4].mxu0 %vm96_vm0, %v2157_v5 }
  0xdd   :  { %v2033_v21 = vpop.f32.mrb[0].mxu0 }
  0xde   :  { %v143_v22 = vpop.f32.mrb[1].mxu0  ;;  %v152_v24 = vadd.f32 %v2033_v21, %v63_v20 }
  0xdf   :  { %v2034_v23 = vpop.f32.mrb[2].mxu0  ;;  %v144_v27 = vadd.f32 %v143_v22, %v63_v20 }
  0xe0   :  { %v155_v25 = vadd.f32 %v2034_v23, %v63_v20  ;;  %v146_v26 = vpop.f32.mrb[3].mxu0 }
  0xe1   :  { %v147_v28 = vadd.f32 %v146_v26, %v63_v20 }
  0xe2   :  { %v175_v29 = vpack.c.bf16 %v155_v25, %v152_v24 }
  0xe3   :  { %v174_v30 = vpack.c.bf16 %v147_v28, %v144_v27 }
  0xe5   :  { %2175 = vtanh.bf16 %v174_v30  ;;  %v2037_v31 = vpop.f32.mrb[4].mxu0  ;;  %v393_v30 = vpop.permute.xlu0 %392 }
  0xe6   :  { %2177 = vtanh.bf16 %v175_v29  ;;  %v168_v32 = vadd.f32 %v2037_v31, %v63_v20  ;;  %v159_v33 = vpop.f32.mrb[5].mxu0  ;;  %v2162_v31 = vld [vmem:[%s2979_s5] sm:$0xff]  }
  0xe7   :  { %v160_v34 = vadd.f32 %v159_v33, %v63_v20  ;;  %v2038_v35 = vpop.f32.mrb[6].mxu0  ;;  %v397_v33 = vpop.permute.xlu1 %396  ;;  %2073 = vmatprep.subr.bf16.mxu0 %v2162_v31 }
  0xe8   :  { %v171_v36 = vadd.f32 %v2038_v35, %v63_v20  ;;  %v162_v37 = vpop.f32.mrb[7].mxu0 }
  0xe9   :  { %v163_v38 = vadd.f32 %v162_v37, %v63_v20 }
  0xea   :  { %v177_v39 = vpack.c.bf16 %v171_v36, %v168_v32 }
  0xeb   :  { %v176_v40 = vpack.c.bf16 %v163_v38, %v160_v34  ;;  %v395_v34 = vpop.permute.xlu0 %394  ;;  %v399_v35 = vpop.permute.xlu1 %398 }
  0xec   :  { %2179 = vtanh.bf16 %v177_v39 }
  0xed   :  { %2181 = vtanh.bf16 %v176_v40 }
  0xef   :  { %v401_v38 = vpop.permute.xlu0 %400 }
  0xf0   :  { %v2176_v41 = vpop.eup %2175 }
  0xf1   :  { %v2178_v42 = vpop.eup %2177  ;;  %2043 = vmatprep.mubr.msk.bf16.mxu1 %vm96_vm0, %v2176_v41  ;;  %2055 = vmatprep.mubr.msk.bf16.mxu0 %vm96_vm0, %v2176_v41  ;;  %v403_v41 = vpop.permute.xlu1 %402 }
  0xf2   :  { %2044 = vmatmul.mubr.msk.bf16.vlgmr.msra.gmra.mrb[0].mxu1 %vm96_vm0, %v2178_v42  ;;  %2056 = vmatmul.mubr.msk.bf16.vlgmr.msra.gmra.mrb[8].mxu0 %vm96_vm0, %v2178_v42 }
  0xf3   :  { %2064 = vmatpush3.bf16.msra.mxu1 %v589_v46  ;;  %2074 = vmatpush3.bf16.msra.mxu0 %v2162_v31 }
  0xf7   :  { %v2180_v43 = vpop.eup %2179 }
  0xf8   :  { %v2182_v44 = vpop.eup %2181 }
  0xf9   :  { %2047 = vmatprep.mubr.msk.bf16.mxu1 %vm96_vm0, %v2182_v44  ;;  %2059 = vmatprep.mubr.msk.bf16.mxu0 %vm96_vm0, %v2182_v44 }
  0xfa   :  { %2048 = vmatmul.mubr.msk.bf16.gmra.mrb[4].mxu1 %vm96_vm0, %v2180_v43  ;;  %2060 = vmatmul.mubr.msk.bf16.gmra.mrb[12].mxu0 %vm96_vm0, %v2180_v43 }
 0x1c5   :  { %v2045_v51 = vpop.f32.mrb[0].mxu1  ;;  %v2057_v52 = vpop.f32.mrb[8].mxu0 }
 0x1c6   :  { %v2458_v53 = vadd.f32 %v2045_v51, %v189_v49  ;;  %v248_v54 = vpop.f32.mrb[1].mxu1  ;;  %v333_v55 = vpop.f32.mrb[9].mxu0  ;;  %v342_v58 = vadd.f32 %v2057_v52, %v286_v50 }
 0x1c7   :  { %v2046_v56 = vpop.f32.mrb[2].mxu1  ;;  %v2058_v57 = vpop.f32.mrb[10].mxu0  ;;  %v334_v63 = vadd.f32 %v333_v55, %v286_v50  ;;  %v2464_v1 = vadd.f32 %v248_v54, %v189_v49 }
 0x1c8   :  { %v2460_v59 = vadd.f32 %v2046_v56, %v189_v49  ;;  %v345_v60 = vadd.f32 %v2058_v57, %v286_v50  ;;  %v336_v61 = vpop.f32.mrb[11].mxu0  ;;  %436 = vrot.lane.b32.xlu0 %v2458_v53, %s2312_s20  ;;  %v251_v62 = vpop.f32.mrb[3].mxu1  ;;  %v372_v27 = vmul.f32 1.442695, %v2458_v53 }
 0x1c9   :  { %v337_v0 = vadd.f32 %v336_v61, %v286_v50  ;;  %v2468_v4 = vadd.f32 %v251_v62, %v189_v49  ;;  %v368_v29 = vmul.f32 1.442695, %v2464_v1 }
 0x1ca   :  { %v365_v2 = vpack.c.bf16 %v345_v60, %v342_v58  ;;  %438 = vrot.lane.b32.xlu1 %v2460_v59, %s2312_s20  ;;  %v374_v28 = vmul.f32 1.442695, %v2460_v59  ;;  %2183 = vpow2.f32 %v372_v27 }
 0x1cb   :  { %v364_v3 = vpack.c.bf16 %v337_v0, %v334_v63  ;;  %v370_v32 = vmul.f32 1.442695, %v2468_v4 }
 0x1cc   :  { %432 = vrot.lane.b32.xlu0 %v2464_v1, %s2312_s20  ;;  %2185 = vpow2.f32 %v374_v28 }
 0x1cd   :  { %v2049_v5 = vpop.f32.mrb[4].mxu1  ;;  %v2061_v6 = vpop.f32.mrb[12].mxu0  ;;  %2065 = vmatprep.mubr.msk.bf16.mxu1 %vm574_vm2, %v364_v3  ;;  %2187 = vpow2.f32 %v368_v29  ;;  %v2163_v3 = vld [vmem:[%s2980_s7] sm:$0xff]  }
 0x1ce   :  { %v264_v8 = vpop.f32.mrb[5].mxu1  ;;  %v349_v9 = vpop.f32.mrb[13].mxu0  ;;  %2066 = vmatmul.mubr.msk.bf16.vlgmr.msra.gmra.mrb[8].mxu1 %vm574_vm2, %v365_v2  ;;  %434 = vrot.lane.b32.xlu1 %v2468_v4, %s2312_s20  ;;  %v358_v13 = vadd.f32 %v2061_v6, %v286_v50  ;;  %v2491_v25 = vadd.f32 %v2049_v5, %v189_v49  ;;  %2189 = vpow2.f32 %v370_v32  ;;  %v2164_v6 = vld [vmem:[%s2980_s7 + $0x8] sm:$0xff]  }
 0x1cf   :  { %v2050_v10 = vpop.f32.mrb[6].mxu1  ;;  %v2062_v11 = vpop.f32.mrb[14].mxu0  ;;  %v350_v18 = vadd.f32 %v349_v9, %v286_v50  ;;  %v2483_v21 = vadd.f32 %v264_v8, %v189_v49  ;;  %2083 = vmatprep.subr.bf16.mxu1 %v2163_v3 }
 0x1d0   :  { %v361_v14 = vadd.f32 %v2062_v11, %v286_v50  ;;  %v267_v15 = vpop.f32.mrb[7].mxu1  ;;  %v352_v16 = vpop.f32.mrb[15].mxu0  ;;  %404 = vrot.lane.b32.xlu0 %v53_v7, %s2312_s20  ;;  %v2496_v26 = vadd.f32 %v2050_v10, %v189_v49  ;;  %v380_v44 = vmul.f32 1.442695, %v2491_v25  ;;  %2084 = vmatpush3.bf16.msra.mxu1 %v2163_v3 }
 0x1d1   :  { %v353_v20 = vadd.f32 %v352_v16, %v286_v50  ;;  %v2486_v24 = vadd.f32 %v267_v15, %v189_v49  ;;  %v376_v36 = vmul.f32 1.442695, %v2483_v21  ;;  %2085 = vmatprep.subr.bf16.mxu1 %v2164_v6 }
 0x1d2   :  { %v367_v22 = vpack.c.bf16 %v361_v14, %v358_v13  ;;  %406 = vrot.lane.b32.xlu1 %v54_v12, %s2312_s20  ;;  %v382_v48 = vmul.f32 1.442695, %v2496_v26 }
 0x1d3   :  { %v366_v23 = vpack.c.bf16 %v353_v20, %v350_v18  ;;  %v378_v37 = vmul.f32 1.442695, %v2486_v24  ;;  %2191 = vpow2.f32 %v376_v36 }
 0x1d4   :  { %440 = vrot.lane.b32.xlu0 %v2483_v21, %s2312_s20  ;;  %v2184_v39 = vpop.eup %2183  ;;  %2086 = vmatpush3.bf16.msra.mxu1 %v2164_v6 }
 0x1d5   :  { %2069 = vmatprep.mubr.msk.bf16.mxu1 %vm574_vm2, %v366_v23  ;;  %2193 = vpow2.f32 %v378_v37  ;;  %v418_v45 = vmul.f32 %v2184_v39, %v397_v33 }
 0x1d6   :  { %2070 = vmatmul.mubr.msk.bf16.gmra.mrb[12].mxu1 %vm574_vm2, %v367_v22  ;;  %442 = vrot.lane.b32.xlu1 %v2486_v24, %s2312_s20  ;;  %v2186_v40 = vpop.eup %2185  ;;  %2195 = vpow2.f32 %v380_v44 }
 0x1d7   :  { %v2188_v43 = vpop.eup %2187  ;;  %v419_v46 = vmul.f32 %v2186_v40, %v399_v35  ;;  %2197 = vpow2.f32 %v382_v48  ;;  %v2165_v40 = vld [vmem:[%s2980_s7 + $0x10] sm:$0xff]  }
 0x1d8   :  { %444 = vrot.lane.b32.xlu0 %v2491_v25, %s2312_s20  ;;  %v2190_v47 = vpop.eup %2189  ;;  %v416_v54 = vmul.f32 %v2188_v43, %v393_v30  ;;  %2087 = vmatprep.subr.bf16.mxu1 %v2165_v40 }
 0x1d9   :  { %v417_v55 = vmul.f32 %v2190_v47, %v395_v34  ;;  %2088 = vmatpush3.bf16.msra.mxu1 %v2165_v40 }
 0x1da   :  { %446 = vrot.lane.b32.xlu1 %v2496_v26, %s2312_s20 }
 0x1dd   :  { %v2192_v62 = vpop.eup %2191 }
 0x1de   :  { %v420_v7 = vmul.f32 %v2192_v62, %v401_v38 }
 0x1df   :  { %v2194_v0 = vpop.eup %2193 }
 0x1e0   :  { %v421_v8 = vmul.f32 %v2194_v0, %v403_v41  ;;  %v2196_v10 = vpop.eup %2195  ;;  %v2166_v41 = vld [vmem:[%s2980_s7 + $0x18] sm:$0xff]  }
 0x1e1   :  { %v2198_v13 = vpop.eup %2197  ;;  %2089 = vmatprep.subr.bf16.mxu1 %v2166_v41 }
 0x1e2   :  { %2090 = vmatpush3.bf16.msra.mxu1 %v2166_v41 }
 0x23a   :  { %v437_v42 = vpop.permute.xlu0 %436 }
 0x23b   :  { %v2513_v50 = vadd.f32 %v437_v42, %v418_v45  ;;  %v572_v42 = vsub.s32 3, %v2434_v17 }
 0x23c   :  { %v439_v49 = vpop.permute.xlu1 %438 }
 0x23d   :  { %v2515_v51 = vadd.f32 %v439_v49, %v419_v46  ;;  %v573_v43 = vrot.slane %v2440_v19, %v572_v42 }
 0x23e   :  { %v433_v52 = vpop.permute.xlu0 %432 }
 0x23f   :  { %v657_v56 = vpack.c.bf16 %v2515_v51, %v2513_v50  ;;  %v2519_v58 = vadd.f32 %v433_v52, %v416_v54 }
 0x240   :  { %v435_v57 = vpop.permute.xlu1 %434 }
 0x241   :  { %v2521_v60 = vadd.f32 %v435_v57, %v417_v55  ;;  %668 = vrot.lane.b32.xlu1 %v657_v56, %s2313_s0 }
 0x242   :  { %v405_v61 = vpop.permute.xlu0 %404 }
 0x243   :  { %v656_v63 = vpack.c.bf16 %v2521_v60, %v2519_v58  ;;  %v422_v15 = vmul.f32 %v2196_v10, %v405_v61 }
 0x244   :  { %v407_v2 = vpop.permute.xlu1 %406 }
 0x245   :  { %666 = vrot.lane.b32.xlu0 %v656_v63, %s2313_s0  ;;  %v423_v16 = vmul.f32 %v2198_v13, %v407_v2 }
 0x246   :  { %v441_v5 = vpop.permute.xlu0 %440 }
 0x247   :  { %v2533_v11 = vadd.f32 %v441_v5, %v420_v7 }
 0x248   :  { %v443_v9 = vpop.permute.xlu1 %442 }
 0x249   :  { %v2535_v12 = vadd.f32 %v443_v9, %v421_v8 }
 0x24a   :  { %v445_v14 = vpop.permute.xlu0 %444 }
 0x24b   :  { %v658_v18 = vpack.c.bf16 %v2535_v12, %v2533_v11  ;;  %v2539_v22 = vadd.f32 %v445_v14, %v422_v15 }
 0x24c   :  { %v447_v20 = vpop.permute.xlu1 %446 }
 0x24d   :  { %v2541_v23 = vadd.f32 %v447_v20, %v423_v16  ;;  %670 = vrot.lane.b32.xlu0 %v658_v18, %s2313_s0 }
 0x24f   :  { %v659_v27 = vpack.c.bf16 %v2541_v23, %v2539_v22 }
 0x251   :  { %672 = vrot.lane.b32.xlu1 %v659_v27, %s2313_s0 }
 0x2a1   :  { %v2067_v28 = vpop.f32.mrb[8].mxu1 }
 0x2a2   :  { %v625_v29 = vpop.f32.mrb[9].mxu1  ;;  %v2559_v44 = vadd.f32 %v2067_v28, %v573_v43 }
 0x2a3   :  { %v2068_v30 = vpop.f32.mrb[10].mxu1  ;;  %v2561_v45 = vadd.f32 %v625_v29, %v573_v43 }
 0x2a4   :  { %v628_v31 = vpop.f32.mrb[11].mxu1  ;;  %v2563_v47 = vadd.f32 %v2068_v30, %v573_v43 }
 0x2a5   :  { %v2566_v52 = vadd.f32 %v628_v31, %v573_v43 }
 0x2a9   :  { %v2071_v32 = vpop.f32.mrb[12].mxu1 }
 0x2aa   :  { %v641_v33 = vpop.f32.mrb[13].mxu1  ;;  %v2571_v6 = vadd.f32 %v2071_v32, %v573_v43 }
 0x2ab   :  { %v2072_v34 = vpop.f32.mrb[14].mxu1  ;;  %v2574_v7 = vadd.f32 %v641_v33, %v573_v43 }
 0x2ac   :  { %v644_v35 = vpop.f32.mrb[15].mxu1  ;;  %v2577_v9 = vadd.f32 %v2072_v34, %v573_v43  ;;  %v779_v34 = vsub.s32 4, %v2434_v17 }
 0x2ad   :  { %v2580_v14 = vadd.f32 %v644_v35, %v573_v43 }
 0x2ae   :  { %v780_v35 = vrot.slane %v2440_v19, %v779_v34 }
 0x2b3   :  { %v669_v37 = vpop.permute.xlu1 %668 }
 0x2b7   :  { %v667_v36 = vpop.permute.xlu0 %666 }
 0x2b8   :  { %2075 = vmatprep.mubr.msk.bf16.mxu0 %vm560_vm3, %v667_v36 }
 0x2b9   :  { %2076 = vmatmul.mubr.msk.bf16.vlgmr.msra.gmra.mrb[16].mxu0 %vm560_vm3, %v669_v37 }
 0x2bf   :  { %v671_v38 = vpop.permute.xlu0 %670 }
 0x2c0   :  { %2079 = vmatprep.mubr.msk.bf16.mxu0 %vm560_vm3, %v671_v38 }
 0x2c3   :  { %v673_v39 = vpop.permute.xlu1 %672 }
 0x2c4   :  { %2080 = vmatmul.mubr.msk.bf16.gmra.mrb[20].mxu0 %vm560_vm3, %v673_v39 }
 0x38c   :  { %v2077_v46 = vpop.f32.mrb[16].mxu0 }
 0x38d   :  { %v735_v48 = vadd.f32 %v2077_v46, %v2559_v44  ;;  %v726_v49 = vpop.f32.mrb[17].mxu0 }
 0x38e   :  { %v727_v54 = vadd.f32 %v726_v49, %v2561_v45  ;;  %v2078_v55 = vpop.f32.mrb[18].mxu0 }
 0x38f   :  { %v738_v56 = vadd.f32 %v2078_v55, %v2563_v47  ;;  %v729_v57 = vpop.f32.mrb[19].mxu0  ;;  %v759_v62 = vmax.f32 %v735_v48, 0.0 }
 0x390   :  { %v730_v61 = vadd.f32 %v729_v57, %v2566_v52  ;;  %v757_v0 = vmax.f32 %v727_v54, 0.0 }
 0x391   :  { %v760_v63 = vmax.f32 %v738_v56, 0.0 }
 0x392   :  { %v758_v2 = vmax.f32 %v730_v61, 0.0 }
 0x393   :  { %v766_v3 = vpack.c.bf16 %v760_v63, %v759_v62  ;;  %v2167_v62 = vld [vmem:[%s2979_s5 + $0x8] sm:$0xff]   ;;  %s2314_s5 = smov 64  }
 0x394   :  { %v765_v5 = vpack.c.bf16 %v758_v2, %v757_v0  ;;  %2099 = vmatprep.subr.bf16.mxu0 %v2167_v62 }
 0x395   :  { %2100 = vmatpush3.bf16.msra.mxu0 %v2167_v62 }
 0x396   :  { %2091 = vmatprep.mubr.msk.bf16.mxu1 %vm805_vm4, %v765_v5 }
 0x397   :  { %v2081_v8 = vpop.f32.mrb[20].mxu0  ;;  %2092 = vmatmul.mubr.msk.bf16.vlgmr.msra.gmra.mrb[16].mxu1 %vm805_vm4, %v766_v3 }
 0x398   :  { %v751_v10 = vadd.f32 %v2081_v8, %v2571_v6  ;;  %v742_v13 = vpop.f32.mrb[21].mxu0 }
 0x399   :  { %v743_v15 = vadd.f32 %v742_v13, %v2574_v7  ;;  %v2082_v16 = vpop.f32.mrb[22].mxu0 }
 0x39a   :  { %v754_v18 = vadd.f32 %v2082_v16, %v2577_v9  ;;  %v745_v20 = vpop.f32.mrb[23].mxu0  ;;  %v763_v28 = vmax.f32 %v751_v10, 0.0 }
 0x39b   :  { %v746_v27 = vadd.f32 %v745_v20, %v2580_v14  ;;  %v761_v30 = vmax.f32 %v743_v15, 0.0 }
 0x39c   :  { %v764_v29 = vmax.f32 %v754_v18, 0.0 }
 0x39d   :  { %v762_v31 = vmax.f32 %v746_v27, 0.0 }
 0x39e   :  { %v768_v32 = vpack.c.bf16 %v764_v29, %v763_v28 }
 0x39f   :  { %v767_v33 = vpack.c.bf16 %v762_v31, %v761_v30 }
 0x3a1   :  { %2095 = vmatprep.mubr.msk.bf16.mxu1 %vm805_vm4, %v767_v33 }
 0x3a2   :  { %2096 = vmatmul.mubr.msk.bf16.gmra.mrb[20].mxu1 %vm805_vm4, %v768_v32 }
 0x46a   :  { %v2093_v36 = vpop.f32.mrb[16].mxu1 }
 0x46b   :  { %v852_v37 = vpop.f32.mrb[17].mxu1  ;;  %v861_v42 = vadd.f32 %v2093_v36, %v780_v35 }
 0x46c   :  { %v853_v38 = vadd.f32 %v852_v37, %v780_v35  ;;  %v2094_v39 = vpop.f32.mrb[18].mxu1 }
 0x46d   :  { %v855_v40 = vpop.f32.mrb[19].mxu1  ;;  %v864_v43 = vadd.f32 %v2094_v39, %v780_v35  ;;  %v1919_v2 = vmul.f32 -1.442695, %v861_v42 }
 0x46e   :  { %v856_v41 = vadd.f32 %v855_v40, %v780_v35  ;;  %955 = vrot.lane.b32.xlu0 %v853_v38, %s2312_s20  ;;  %v1917_v63 = vmul.f32 -1.442695, %v853_v38 }
 0x46f   :  { %v1920_v3 = vmul.f32 -1.442695, %v864_v43 }
 0x470   :  { %957 = vrot.lane.b32.xlu1 %v856_v41, %s2312_s20  ;;  %v1918_v0 = vmul.f32 -1.442695, %v856_v41  ;;  %2199 = vpow2.f32 %v1917_v63 }
 0x472   :  { %959 = vrot.lane.b32.xlu0 %v861_v42, %s2312_s20  ;;  %2201 = vpow2.f32 %v1918_v0 }
 0x473   :  { %2203 = vpow2.f32 %v1919_v2 }
 0x474   :  { %961 = vrot.lane.b32.xlu1 %v864_v43, %s2312_s20  ;;  %2205 = vpow2.f32 %v1920_v3 }
 0x475   :  { %v2097_v46 = vpop.f32.mrb[20].mxu1 }
 0x476   :  { %v868_v48 = vpop.f32.mrb[21].mxu1  ;;  %v877_v57 = vadd.f32 %v2097_v46, %v780_v35 }
 0x477   :  { %v869_v49 = vadd.f32 %v868_v48, %v780_v35  ;;  %v2098_v54 = vpop.f32.mrb[22].mxu1 }
 0x478   :  { %v871_v55 = vpop.f32.mrb[23].mxu1  ;;  %v880_v61 = vadd.f32 %v2098_v54, %v780_v35  ;;  %v1923_v13 = vmul.f32 -1.442695, %v877_v57 }
 0x479   :  { %v872_v56 = vadd.f32 %v871_v55, %v780_v35  ;;  %963 = vrot.lane.b32.xlu0 %v869_v49, %s2312_s20  ;;  %v1921_v5 = vmul.f32 -1.442695, %v869_v49 }
 0x47a   :  { %v2200_v8 = vpop.eup %2199  ;;  %v1924_v20 = vmul.f32 -1.442695, %v880_v61 }
 0x47b   :  { %965 = vrot.lane.b32.xlu1 %v872_v56, %s2312_s20  ;;  %v1922_v10 = vmul.f32 -1.442695, %v872_v56  ;;  %2207 = vpow2.f32 %v1921_v5  ;;  %v907_v16 = vadd.f32 1.0, %v2200_v8 }
 0x47c   :  { %v2202_v15 = vpop.eup %2201 }
 0x47d   :  { %967 = vrot.lane.b32.xlu0 %v877_v57, %s2312_s20  ;;  %v2204_v18 = vpop.eup %2203  ;;  %2209 = vpow2.f32 %v1922_v10  ;;  %v908_v27 = vadd.f32 1.0, %v2202_v15 }
 0x47e   :  { %2211 = vpow2.f32 %v1923_v13  ;;  %v2206_v28 = vpop.eup %2205  ;;  %v909_v29 = vadd.f32 1.0, %v2204_v18 }
 0x47f   :  { %969 = vrot.lane.b32.xlu1 %v880_v61, %s2312_s20  ;;  %2213 = vrcp.f32 %v907_v16  ;;  %v910_v30 = vadd.f32 1.0, %v2206_v28 }
 0x480   :  { %2215 = vpow2.f32 %v1924_v20 }
 0x481   :  { %2217 = vrcp.f32 %v908_v27 }
 0x482   :  { %2219 = vrcp.f32 %v909_v29 }
 0x483   :  { %2221 = vrcp.f32 %v910_v30 }
 0x485   :  { %v2208_v31 = vpop.eup %2207 }
 0x486   :  { %v911_v33 = vadd.f32 1.0, %v2208_v31 }
 0x487   :  { %v2210_v32 = vpop.eup %2209 }
 0x488   :  { %v2212_v34 = vpop.eup %2211  ;;  %v912_v36 = vadd.f32 1.0, %v2210_v32  ;;  %2223 = vrcp.f32 %v911_v33 }
 0x489   :  { %v2600_v35 = vpop.eup %2213  ;;  %v913_v38 = vadd.f32 1.0, %v2212_v34 }
 0x48a   :  { %v2216_v37 = vpop.eup %2215  ;;  %2225 = vrcp.f32 %v912_v36  ;;  %v939_v42 = vsub.f32 1.0, %v2600_v35  ;;  %v931_v56 = vmul.f32 %v2600_v35, %v2519_v58 }
 0x48b   :  { %v2602_v39 = vpop.eup %2217  ;;  %v914_v41 = vadd.f32 1.0, %v2216_v37  ;;  %2227 = vrcp.f32 %v913_v38 }
 0x48c   :  { %v2604_v40 = vpop.eup %2219  ;;  %v940_v48 = vsub.f32 1.0, %v2602_v39  ;;  %v932_v57 = vmul.f32 %v2602_v39, %v2521_v60 }
 0x48d   :  { %v2608_v49 = vpop.eup %2221  ;;  %v941_v55 = vsub.f32 1.0, %v2604_v40  ;;  %2229 = vrcp.f32 %v914_v41  ;;  %v933_v10 = vmul.f32 %v2604_v40, %v2513_v50 }
 0x48e   :  { %v942_v3 = vsub.f32 1.0, %v2608_v49  ;;  %v934_v58 = vmul.f32 %v2608_v49, %v2515_v51 }
 0x492   :  { %v2620_v8 = vpop.eup %2223 }
 0x493   :  { %v943_v20 = vsub.f32 1.0, %v2620_v8  ;;  %v935_v32 = vmul.f32 %v2620_v8, %v2533_v11 }
 0x494   :  { %v2628_v15 = vpop.eup %2225 }
 0x495   :  { %v2636_v27 = vpop.eup %2227  ;;  %v944_v29 = vsub.f32 1.0, %v2628_v15  ;;  %v936_v33 = vmul.f32 %v2628_v15, %v2535_v12 }
 0x496   :  { %v945_v36 = vsub.f32 1.0, %v2636_v27 }
 0x497   :  { %v2641_v30 = vpop.eup %2229 }
 0x498   :  { %v938_v11 = vmul.f32 %v2641_v30, %v2541_v23  ;;  %v2169_v23 = vld [vmem:[%s2980_s7 + $0x28] sm:$0xff]  }
 0x4e0   :  { %v956_v43 = vpop.permute.xlu0 %955 }
 0x4e1   :  { %v979_v46 = vmul.f32 %v956_v43, %v939_v42  ;;  %v946_v43 = vsub.f32 1.0, %v2641_v30 }
 0x4e2   :  { %v958_v54 = vpop.permute.xlu1 %957 }
 0x4e3   :  { %v980_v61 = vmul.f32 %v958_v54, %v940_v48  ;;  %v2615_v63 = vadd.f32 %v979_v46, %v931_v56  ;;  %v937_v48 = vmul.f32 %v2636_v27, %v2539_v22  ;;  %v2168_v22 = vld [vmem:[%s2980_s7 + $0x20] sm:$0xff]  }
 0x4e4   :  { %v960_v62 = vpop.permute.xlu0 %959  ;;  %2109 = vmatprep.subr.bf16.mxu1 %v2168_v22 }
 0x4e5   :  { %v2617_v0 = vadd.f32 %v980_v61, %v932_v57  ;;  %v981_v2 = vmul.f32 %v960_v62, %v941_v55  ;;  %2110 = vmatpush3.bf16.msra.mxu1 %v2168_v22 }
 0x4e6   :  { %v962_v5 = vpop.permute.xlu1 %961  ;;  %2111 = vmatprep.subr.bf16.mxu1 %v2169_v23 }
 0x4e7   :  { %v982_v13 = vmul.f32 %v962_v5, %v942_v3  ;;  %v1075_v60 = vpack.c.bf16 %v2617_v0, %v2615_v63  ;;  %v2630_v16 = vadd.f32 %v981_v2, %v933_v10 }
 0x4e9   :  { %v2632_v18 = vadd.f32 %v982_v13, %v934_v58  ;;  %1086 = vrot.lane.b32.xlu0 %v1075_v60, %s2313_s0  ;;  %2112 = vmatpush3.bf16.msra.mxu1 %v2169_v23 }
 0x4eb   :  { %v964_v50 = vpop.permute.xlu0 %963  ;;  %v1076_v51 = vpack.c.bf16 %v2632_v18, %v2630_v16 }
 0x4ec   :  { %v983_v28 = vmul.f32 %v964_v50, %v943_v20 }
 0x4ed   :  { %v966_v31 = vpop.permute.xlu1 %965  ;;  %1088 = vrot.lane.b32.xlu1 %v1076_v51, %s2313_s0 }
 0x4ee   :  { %v984_v34 = vmul.f32 %v966_v31, %v944_v29  ;;  %v2649_v38 = vadd.f32 %v983_v28, %v935_v32 }
 0x4ef   :  { %v968_v37 = vpop.permute.xlu0 %967 }
 0x4f0   :  { %v2651_v41 = vadd.f32 %v984_v34, %v936_v33  ;;  %v985_v42 = vmul.f32 %v968_v37, %v945_v36 }
 0x4f1   :  { %v970_v46 = vpop.permute.xlu1 %969 }
 0x4f2   :  { %v986_v54 = vmul.f32 %v970_v46, %v946_v43  ;;  %v1077_v12 = vpack.c.bf16 %v2651_v41, %v2649_v38  ;;  %v2660_v55 = vadd.f32 %v985_v42, %v937_v48 }
 0x4f4   :  { %v2662_v56 = vadd.f32 %v986_v54, %v938_v11  ;;  %1090 = vrot.lane.b32.xlu0 %v1077_v12, %s2313_s0 }
 0x4f6   :  { %v1078_v57 = vpack.c.bf16 %v2662_v56, %v2660_v55 }
 0x4f8   :  { %1108 = vrot.lane.b32.xlu0 %v2561_v45, %s2314_s5  ;;  %1092 = vrot.lane.b32.xlu1 %v1078_v57, %s2313_s0 }
 0x4fc   :  { %1112 = vrot.lane.b32.xlu0 %v2559_v44, %s2314_s5  ;;  %1110 = vrot.lane.b32.xlu1 %v2566_v52, %s2314_s5 }
 0x500   :  { %1116 = vrot.lane.b32.xlu0 %v2574_v7, %s2314_s5  ;;  %1114 = vrot.lane.b32.xlu1 %v2563_v47, %s2314_s5  ;;  %v2170_v47 = vld [vmem:[%s2980_s7 + $0x30] sm:$0xff]  }
 0x501   :  { %2113 = vmatprep.subr.bf16.mxu1 %v2170_v47 }
 0x502   :  { %2114 = vmatpush3.bf16.msra.mxu1 %v2170_v47  ;;  %v1232_v47 = vsub.s32 5, %v2434_v17 }
 0x504   :  { %1120 = vrot.lane.b32.xlu0 %v2571_v6, %s2314_s5  ;;  %1118 = vrot.lane.b32.xlu1 %v2580_v14, %s2314_s5  ;;  %v2171_v6 = vld [vmem:[%s2980_s7 + $0x38] sm:$0xff]  }
 0x505   :  { %2115 = vmatprep.subr.bf16.mxu1 %v2171_v6 }
 0x506   :  { %2116 = vmatpush3.bf16.msra.mxu1 %v2171_v6  ;;  %v1233_v6 = vrot.slane %v2440_v19, %v1232_v47 }
 0x508   :  { %1122 = vrot.lane.b32.xlu1 %v2577_v9, %s2314_s5 }
 0x55b   :  { %v1087_v45 = vpop.permute.xlu0 %1086 }
 0x55c   :  { %2101 = vmatprep.mubr.msk.bf16.mxu0 %vm560_vm3, %v1087_v45 }
 0x55f   :  { %v1089_v44 = vpop.permute.xlu1 %1088 }
 0x560   :  { %2102 = vmatmul.mubr.msk.bf16.vlgmr.msra.gmra.mrb[24].mxu0 %vm560_vm3, %v1089_v44 }
 0x566   :  { %v1091_v52 = vpop.permute.xlu0 %1090 }
 0x567   :  { %2105 = vmatprep.mubr.msk.bf16.mxu0 %vm560_vm3, %v1091_v52 }
 0x56a   :  { %v1093_v61 = vpop.permute.xlu1 %1092  ;;  %v1109_v7 = vpop.permute.xlu0 %1108 }
 0x56b   :  { %2106 = vmatmul.mubr.msk.bf16.gmra.mrb[28].mxu0 %vm560_vm3, %v1093_v61 }
 0x56e   :  { %v1111_v9 = vpop.permute.xlu1 %1110  ;;  %v1113_v14 = vpop.permute.xlu0 %1112 }
 0x572   :  { %v1115_v2 = vpop.permute.xlu1 %1114  ;;  %v1117_v50 = vpop.permute.xlu0 %1116 }
 0x576   :  { %v1119_v32 = vpop.permute.xlu1 %1118  ;;  %v1121_v36 = vpop.permute.xlu0 %1120 }
 0x57a   :  { %v1123_v46 = vpop.permute.xlu1 %1122 }
 0x633   :  { %v2103_v62 = vpop.f32.mrb[24].mxu0 }
 0x634   :  { %v1187_v3 = vadd.f32 %v2103_v62, %v1113_v14  ;;  %v1178_v5 = vpop.f32.mrb[25].mxu0 }
 0x635   :  { %v1179_v10 = vadd.f32 %v1178_v5, %v1109_v7  ;;  %v2104_v58 = vpop.f32.mrb[26].mxu0 }
 0x636   :  { %v1190_v13 = vadd.f32 %v2104_v58, %v1115_v2  ;;  %v1181_v60 = vpop.f32.mrb[27].mxu0  ;;  %v1211_v51 = vmax.f32 %v1187_v3, 0.0 }
 0x637   :  { %v1182_v20 = vadd.f32 %v1181_v60, %v1111_v9  ;;  %v1209_v29 = vmax.f32 %v1179_v10, 0.0 }
 0x638   :  { %v1212_v28 = vmax.f32 %v1190_v13, 0.0 }
 0x639   :  { %v1210_v31 = vmax.f32 %v1182_v20, 0.0 }
 0x63a   :  { %v1218_v33 = vpack.c.bf16 %v1212_v28, %v1211_v51 }
 0x63b   :  { %v1217_v34 = vpack.c.bf16 %v1210_v31, %v1209_v29  ;;  %v2172_v29 = vld [vmem:[%s2981_s8] sm:$0xff]  }
 0x63c   :  { %2125 = vmatprep.subr.bf16.mxu0 %v2172_v29 }
 0x63d   :  { %2117 = vmatprep.mubr.msk.bf16.mxu1 %vm805_vm4, %v1217_v34  ;;  %2126 = vmatpush3.bf16.msra.mxu0 %v2172_v29 }
 0x63e   :  { %v2107_v37 = vpop.f32.mrb[28].mxu0  ;;  %2118 = vmatmul.mubr.msk.bf16.vlgmr.msra.gmra.mrb[24].mxu1 %vm805_vm4, %v1218_v33 }
 0x63f   :  { %v1203_v42 = vadd.f32 %v2107_v37, %v1121_v36  ;;  %v1194_v43 = vpop.f32.mrb[29].mxu0 }
 0x640   :  { %v1195_v48 = vadd.f32 %v1194_v43, %v1117_v50  ;;  %v2108_v11 = vpop.f32.mrb[30].mxu0 }
 0x641   :  { %v1206_v54 = vadd.f32 %v2108_v11, %v1123_v46  ;;  %v1197_v12 = vpop.f32.mrb[31].mxu0  ;;  %v1215_v22 = vmax.f32 %v1203_v42, 0.0 }
 0x642   :  { %v1198_v57 = vadd.f32 %v1197_v12, %v1119_v32  ;;  %v1213_v45 = vmax.f32 %v1195_v48, 0.0 }
 0x643   :  { %v1216_v23 = vmax.f32 %v1206_v54, 0.0 }
 0x644   :  { %v1214_v44 = vmax.f32 %v1198_v57, 0.0 }
 0x645   :  { %v1220_v52 = vpack.c.bf16 %v1216_v23, %v1215_v22 }
 0x646   :  { %v1219_v61 = vpack.c.bf16 %v1214_v44, %v1213_v45 }
 0x648   :  { %2121 = vmatprep.mubr.msk.bf16.mxu1 %vm805_vm4, %v1219_v61 }
 0x649   :  { %2122 = vmatmul.mubr.msk.bf16.gmra.mrb[28].mxu1 %vm805_vm4, %v1220_v52 }
 0x711   :  { %v2119_v7 = vpop.f32.mrb[24].mxu1 }
 0x712   :  { %v1304_v9 = vpop.f32.mrb[25].mxu1  ;;  %v1313_v5 = vadd.f32 %v2119_v7, %v1233_v6 }
 0x713   :  { %v1305_v14 = vadd.f32 %v1304_v9, %v1233_v6  ;;  %v2120_v62 = vpop.f32.mrb[26].mxu1 }
 0x714   :  { %v1307_v2 = vpop.f32.mrb[27].mxu1  ;;  %v1316_v10 = vadd.f32 %v2120_v62, %v1233_v6  ;;  %v1950_v33 = vmul.f32 -1.442695, %v1313_v5 }
 0x715   :  { %v1308_v3 = vadd.f32 %v1307_v2, %v1233_v6  ;;  %1407 = vrot.lane.b32.xlu0 %v1305_v14, %s2312_s20  ;;  %v1948_v31 = vmul.f32 -1.442695, %v1305_v14 }
 0x716   :  { %v1951_v34 = vmul.f32 -1.442695, %v1316_v10 }
 0x717   :  { %1409 = vrot.lane.b32.xlu1 %v1308_v3, %s2312_s20  ;;  %v1949_v32 = vmul.f32 -1.442695, %v1308_v3  ;;  %2231 = vpow2.f32 %v1948_v31 }
 0x719   :  { %1411 = vrot.lane.b32.xlu0 %v1313_v5, %s2312_s20  ;;  %2233 = vpow2.f32 %v1949_v32 }
 0x71a   :  { %2235 = vpow2.f32 %v1950_v33 }
 0x71b   :  { %1413 = vrot.lane.b32.xlu1 %v1316_v10, %s2312_s20  ;;  %2237 = vpow2.f32 %v1951_v34 }
 0x71c   :  { %v2123_v58 = vpop.f32.mrb[28].mxu1 }
 0x71d   :  { %v1320_v13 = vpop.f32.mrb[29].mxu1  ;;  %v1329_v51 = vadd.f32 %v2123_v58, %v1233_v6 }
 0x71e   :  { %v1321_v60 = vadd.f32 %v1320_v13, %v1233_v6  ;;  %v2124_v19 = vpop.f32.mrb[30].mxu1 }
 0x71f   :  { %v1323_v20 = vpop.f32.mrb[31].mxu1  ;;  %v1332_v28 = vadd.f32 %v2124_v19, %v1233_v6  ;;  %v1954_v43 = vmul.f32 -1.442695, %v1329_v51 }
 0x720   :  { %v1324_v50 = vadd.f32 %v1323_v20, %v1233_v6  ;;  %1415 = vrot.lane.b32.xlu0 %v1321_v60, %s2312_s20  ;;  %v1952_v36 = vmul.f32 -1.442695, %v1321_v60 }
 0x721   :  { %v2232_v37 = vpop.eup %2231  ;;  %v1955_v54 = vmul.f32 -1.442695, %v1332_v28 }
 0x722   :  { %1417 = vrot.lane.b32.xlu1 %v1324_v50, %s2312_s20  ;;  %v1953_v42 = vmul.f32 -1.442695, %v1324_v50  ;;  %2239 = vpow2.f32 %v1952_v36  ;;  %v1359_v48 = vadd.f32 1.0, %v2232_v37 }
 0x723   :  { %v2234_v46 = vpop.eup %2233 }
 0x724   :  { %1419 = vrot.lane.b32.xlu0 %v1329_v51, %s2312_s20  ;;  %v2236_v11 = vpop.eup %2235  ;;  %2241 = vpow2.f32 %v1953_v42  ;;  %v1360_v12 = vadd.f32 1.0, %v2234_v46 }
 0x725   :  { %2243 = vpow2.f32 %v1954_v43  ;;  %v2238_v57 = vpop.eup %2237  ;;  %v1361_v22 = vadd.f32 1.0, %v2236_v11 }
 0x726   :  { %1421 = vrot.lane.b32.xlu1 %v1332_v28, %s2312_s20  ;;  %2245 = vrcp.f32 %v1359_v48  ;;  %v1362_v23 = vadd.f32 1.0, %v2238_v57 }
 0x727   :  { %2247 = vpow2.f32 %v1955_v54 }
 0x728   :  { %2249 = vrcp.f32 %v1360_v12 }
 0x729   :  { %2251 = vrcp.f32 %v1361_v22 }
 0x72a   :  { %2253 = vrcp.f32 %v1362_v23 }
 0x72c   :  { %v2240_v45 = vpop.eup %2239 }
 0x72d   :  { %v1363_v52 = vadd.f32 1.0, %v2240_v45 }
 0x72e   :  { %v2242_v44 = vpop.eup %2241 }
 0x72f   :  { %v2244_v61 = vpop.eup %2243  ;;  %v1364_v6 = vadd.f32 1.0, %v2242_v44  ;;  %2255 = vrcp.f32 %v1363_v52 }
 0x730   :  { %v2709_v47 = vpop.eup %2245  ;;  %v1365_v9 = vadd.f32 1.0, %v2244_v61 }
 0x731   :  { %v2248_v7 = vpop.eup %2247  ;;  %2257 = vrcp.f32 %v1364_v6  ;;  %v1391_v3 = vsub.f32 1.0, %v2709_v47  ;;  %v1383_v20 = vmul.f32 %v2709_v47, %v2615_v63  ;;  %v2303_v6 = vld [vmem:[%s2976_s1] sm:$0xff] }
 0x732   :  { %v2711_v14 = vpop.eup %2249  ;;  %v1366_v2 = vadd.f32 1.0, %v2248_v7  ;;  %2259 = vrcp.f32 %v1365_v9  ;;  %v464_v7 = vmul.f32 %v2303_v6, %v2303_v6 }
 0x733   :  { %v2713_v62 = vpop.eup %2251  ;;  %v1392_v58 = vsub.f32 1.0, %v2711_v14  ;;  %v1384_v50 = vmul.f32 %v2711_v14, %v2617_v0 }
 0x734   :  { %v2717_v13 = vpop.eup %2253  ;;  %v1393_v19 = vsub.f32 1.0, %v2713_v62  ;;  %2261 = vrcp.f32 %v1366_v2  ;;  %v1385_v37 = vmul.f32 %v2713_v62, %v2630_v16 }
 0x735   :  { %v1394_v33 = vsub.f32 1.0, %v2717_v13  ;;  %v1386_v63 = vmul.f32 %v2717_v13, %v2632_v18 }
 0x739   :  { %v2729_v36 = vpop.eup %2255 }
 0x73a   :  { %v1395_v11 = vsub.f32 1.0, %v2729_v36  ;;  %v1387_v45 = vmul.f32 %v2729_v36, %v2649_v38 }
 0x73b   :  { %v2737_v43 = vpop.eup %2257 }
 0x73c   :  { %v2745_v54 = vpop.eup %2259  ;;  %v1396_v57 = vsub.f32 1.0, %v2737_v43  ;;  %v1388_v44 = vmul.f32 %v2737_v43, %v2651_v41 }
 0x73d   :  { %v1397_v61 = vsub.f32 1.0, %v2745_v54  ;;  %v1389_v41 = vmul.f32 %v2745_v54, %v2660_v55 }
 0x73e   :  { %v2750_v22 = vpop.eup %2261 }
 0x787   :  { %v1408_v5 = vpop.permute.xlu0 %1407 }
 0x788   :  { %v1431_v10 = vmul.f32 %v1408_v5, %v1391_v3 }
 0x789   :  { %v1410_v60 = vpop.permute.xlu1 %1409 }
 0x78a   :  { %v1432_v51 = vmul.f32 %v1410_v60, %v1392_v58  ;;  %v2724_v29 = vadd.f32 %v1431_v10, %v1383_v20  ;;  %v1398_v10 = vsub.f32 1.0, %v2750_v22  ;;  %v1390_v58 = vmul.f32 %v2750_v22, %v2662_v56  ;;  %v2304_v20 = vld [vmem:[%s2976_s1 + $0x10] sm:$0xff] }
 0x78b   :  { %v1412_v28 = vpop.permute.xlu0 %1411 }
 0x78c   :  { %v2726_v31 = vadd.f32 %v1432_v51, %v1384_v50  ;;  %v1433_v32 = vmul.f32 %v1412_v28, %v1393_v19  ;;  %v466_v50 = vmul.f32 %v2304_v20, %v2304_v20  ;;  %v472_v51 = vmul.f32 0.5, %v464_v7  ;;  %v2305_v28 = vld [vmem:[%s2976_s1 + $0x8] sm:$0xff] }
 0x78d   :  { %v1414_v34 = vpop.permute.xlu1 %1413 }
 0x78e   :  { %v1434_v42 = vmul.f32 %v1414_v34, %v1394_v33  ;;  %v1527_v0 = vpack.c.bf16 %v2726_v31, %v2724_v29  ;;  %v2739_v46 = vadd.f32 %v1433_v32, %v1385_v37  ;;  %v465_v32 = vmul.f32 %v2305_v28, %v2305_v28  ;;  %v2306_v37 = vld [vmem:[%s2976_s1 + $0x18] sm:$0xff] }
 0x78f   :  { %v474_v34 = vmul.f32 0.5, %v466_v50 }
 0x790   :  { %v2741_v48 = vadd.f32 %v1434_v42, %v1386_v63  ;;  %1541 = vrot.lane.b32.xlu0 %v1527_v0, %s2313_s0  ;;  %v467_v63 = vmul.f32 %v2306_v37, %v2306_v37  ;;  %v473_v42 = vmul.f32 0.5, %v465_v32  ;;  %v2307_v0 = vld [vmem:[%s2976_s1 + $0x20] sm:$0xff]  ;;  %v1005_v32 = vadd.f32 1e-06, %v2604_v40 }
 0x792   :  { %v1416_v16 = vpop.permute.xlu0 %1415  ;;  %v1528_v18 = vpack.c.bf16 %v2741_v48, %v2739_v46 }
 0x793   :  { %v1435_v12 = vmul.f32 %v1416_v16, %v1395_v11  ;;  %v468_v11 = vmul.f32 %v2307_v0, %v2307_v0  ;;  %v475_v16 = vmul.f32 0.5, %v467_v63 }
 0x794   :  { %v1418_v23 = vpop.permute.xlu1 %1417  ;;  %1543 = vrot.lane.b32.xlu1 %v1528_v18, %s2313_s0 }
 0x795   :  { %v1436_v52 = vmul.f32 %v1418_v23, %v1396_v57  ;;  %v2761_v2 = vadd.f32 %v1435_v12, %v1387_v45  ;;  %v476_v18 = vmul.f32 0.5, %v468_v11  ;;  %v2308_v12 = vld [vmem:[%s2976_s1 + $0x28] sm:$0xff]  ;;  %v2309_v23 = vld [vmem:[%s2976_s1 + $0x30] sm:$0xff] }
 0x796   :  { %v1420_v9 = vpop.permute.xlu0 %1419  ;;  %v469_v57 = vmul.f32 %v2308_v12, %v2308_v12  ;;  %v470_v45 = vmul.f32 %v2309_v23, %v2309_v23 }
 0x797   :  { %v2763_v3 = vadd.f32 %v1436_v52, %v1388_v44  ;;  %v1437_v5 = vmul.f32 %v1420_v9, %v1397_v61  ;;  %v2310_v61 = vld [vmem:[%s2976_s1 + $0x38] sm:$0xff] }
 0x798   :  { %v1422_v38 = vpop.permute.xlu1 %1421  ;;  %v477_v44 = vmul.f32 0.5, %v469_v57  ;;  %v478_v52 = vmul.f32 0.5, %v470_v45  ;;  %v471_v6 = vmul.f32 %v2310_v61, %v2310_v61 }
 0x799   :  { %v1438_v60 = vmul.f32 %v1422_v38, %v1398_v10  ;;  %v1529_v19 = vpack.c.bf16 %v2763_v3, %v2761_v2  ;;  %v2778_v33 = vadd.f32 %v1437_v5, %v1389_v41 }
 0x79a   :  { %v479_v7 = vmul.f32 0.5, %v471_v6 }
 0x79b   :  { %v2780_v55 = vadd.f32 %v1438_v60, %v1390_v58  ;;  %1545 = vrot.lane.b32.xlu0 %v1529_v19, %s2313_s0  ;;  %v1003_v60 = vadd.f32 1e-06, %v2600_v35 }
 0x79d   :  { %v1530_v56 = vpack.c.bf16 %v2780_v55, %v2778_v33  ;;  %2263 = vlog2.f32 %v1003_v60 }
 0x79e   :  { %2265 = vlog2.f32 %v1005_v32 }
 0x79f   :  { %488 = vrot.lane.b32.xlu0 %v472_v51, %s2312_s20  ;;  %1547 = vrot.lane.b32.xlu1 %v1530_v56, %s2313_s0  ;;  %v1004_v56 = vadd.f32 1e-06, %v2602_v39 }
 0x7a1   :  { %2267 = vlog2.f32 %v1004_v56 }
 0x7a3   :  { %492 = vrot.lane.b32.xlu0 %v474_v34, %s2312_s20  ;;  %490 = vrot.lane.b32.xlu1 %v473_v42, %s2312_s20 }
 0x7a7   :  { %496 = vrot.lane.b32.xlu0 %v476_v18, %s2312_s20  ;;  %494 = vrot.lane.b32.xlu1 %v475_v16, %s2312_s20  ;;  %v2264_v12 = vpop.eup %2263 }
 0x7ab   :  { %500 = vrot.lane.b32.xlu0 %v478_v52, %s2312_s20  ;;  %498 = vrot.lane.b32.xlu1 %v477_v44, %s2312_s20  ;;  %v1012_v44 = vmul.f32 0.6931472, %v2264_v12  ;;  %v1456_v52 = vadd.f32 1e-06, %v2711_v14  ;;  %v1461_v14 = vadd.f32 1e-06, %v2745_v54 }
 0x7af   :  { %502 = vrot.lane.b32.xlu1 %v479_v7, %s2312_s20 }
 0x802   :  { %v1542_v9 = vpop.permute.xlu0 %1541 }
 0x803   :  { %2127 = vmatprep.mubr.msk.bf16.mxu0 %vm560_vm3, %v1542_v9  ;;  %v1459_v9 = vadd.f32 1e-06, %v2729_v36  ;;  %v1462_v36 = vadd.f32 1e-06, %v2750_v22 }
 0x806   :  { %v1544_v5 = vpop.permute.xlu1 %1543 }
 0x807   :  { %2128 = vmatmul.mubr.msk.bf16.vlgmr.msra.gmra.mrb[32].mxu0 %vm560_vm3, %v1544_v5 }
 0x80d   :  { %v1546_v10 = vpop.permute.xlu0 %1545 }
 0x80e   :  { %2131 = vmatprep.mubr.msk.bf16.mxu0 %vm560_vm3, %v1546_v10 }
 0x811   :  { %v1548_v38 = vpop.permute.xlu1 %1547  ;;  %v489_v41 = vpop.permute.xlu0 %488 }
 0x812   :  { %v512_v58 = vadd.f32 %v489_v41, %v2464_v1  ;;  %2132 = vmatmul.mubr.msk.bf16.gmra.mrb[36].mxu0 %vm560_vm3, %v1548_v38  ;;  %v1460_v41 = vadd.f32 1e-06, %v2737_v43 }
 0x814   :  { %v520_v19 = vadd.f32 0.9189385, %v512_v58 }
 0x815   :  { %v491_v20 = vpop.permute.xlu1 %490  ;;  %v493_v50 = vpop.permute.xlu0 %492 }
 0x816   :  { %v513_v51 = vadd.f32 %v491_v20, %v2468_v4  ;;  %v514_v28 = vadd.f32 %v493_v50, %v2458_v53  ;;  %536 = vrot.lane.b32.xlu0 %v520_v19, %s2313_s0  ;;  %v1006_v53 = vadd.f32 1e-06, %v2608_v49  ;;  %v1007_v4 = vadd.f32 1e-06, %v2620_v8 }
 0x817   :  { %v1008_v49 = vadd.f32 1e-06, %v2628_v15 }
 0x818   :  { %v521_v34 = vadd.f32 0.9189385, %v513_v51  ;;  %v522_v1 = vadd.f32 0.9189385, %v514_v28  ;;  %2269 = vlog2.f32 %v1006_v53 }
 0x819   :  { %v495_v37 = vpop.permute.xlu1 %494  ;;  %v497_v63 = vpop.permute.xlu0 %496  ;;  %2271 = vlog2.f32 %v1007_v4 }
 0x81a   :  { %v515_v35 = vadd.f32 %v495_v37, %v2460_v59  ;;  %v516_v42 = vadd.f32 %v497_v63, %v2483_v21  ;;  %538 = vrot.lane.b32.xlu1 %v521_v34, %s2313_s0  ;;  %540 = vrot.lane.b32.xlu0 %v522_v1, %s2313_s0  ;;  %v1009_v21 = vadd.f32 1e-06, %v2636_v27  ;;  %v2266_v27 = vpop.eup %2265 }
 0x81b   :  { %v2268_v15 = vpop.eup %2267 }
 0x81c   :  { %v523_v40 = vadd.f32 0.9189385, %v515_v35  ;;  %v524_v39 = vadd.f32 0.9189385, %v516_v42  ;;  %2273 = vlog2.f32 %v1009_v21  ;;  %v1014_v6 = vmul.f32 0.6931472, %v2268_v15 }
 0x81d   :  { %v499_v0 = vpop.permute.xlu1 %498  ;;  %v501_v11 = vpop.permute.xlu0 %500  ;;  %2275 = vlog2.f32 %v1008_v49 }
 0x81e   :  { %v517_v16 = vadd.f32 %v499_v0, %v2486_v24  ;;  %v518_v59 = vadd.f32 %v501_v11, %v2491_v25  ;;  %542 = vrot.lane.b32.xlu1 %v523_v40, %s2313_s0  ;;  %544 = vrot.lane.b32.xlu0 %v524_v39, %s2313_s0  ;;  %v1010_v24 = vadd.f32 1e-06, %v2641_v30  ;;  %v1455_v25 = vadd.f32 1e-06, %v2709_v47 }
 0x81f   :  { %v1016_v30 = vmul.f32 0.6931472, %v2266_v27  ;;  %v1458_v47 = vadd.f32 1e-06, %v2717_v13 }
 0x820   :  { %v525_v18 = vadd.f32 0.9189385, %v517_v16  ;;  %v526_v8 = vadd.f32 0.9189385, %v518_v59  ;;  %2277 = vlog2.f32 %v1010_v24 }
 0x821   :  { %v503_v57 = vpop.permute.xlu1 %502  ;;  %2279 = vlog2.f32 %v1455_v25 }
 0x822   :  { %v519_v23 = vadd.f32 %v503_v57, %v2496_v26  ;;  %546 = vrot.lane.b32.xlu1 %v525_v18, %s2313_s0  ;;  %548 = vrot.lane.b32.xlu0 %v526_v8, %s2313_s0  ;;  %v1457_v26 = vadd.f32 1e-06, %v2713_v62  ;;  %v2270_v61 = vpop.eup %2269 }
 0x823   :  { %v2272_v7 = vpop.eup %2271  ;;  %v1018_v10 = vmul.f32 0.6931472, %v2270_v61 }
 0x824   :  { %v527_v45 = vadd.f32 0.9189385, %v519_v23  ;;  %2281 = vlog2.f32 %v1457_v26  ;;  %v1020_v62 = vmul.f32 0.6931472, %v2272_v7 }
 0x825   :  { %2283 = vlog2.f32 %v1456_v52 }
 0x826   :  { %550 = vrot.lane.b32.xlu1 %v527_v45, %s2313_s0  ;;  %1035 = vrot.lane.b32.xlu0 %v1012_v44, %s2313_s0  ;;  %v2274_v5 = vpop.eup %2273  ;;  %2285 = vlog2.f32 %v1458_v47 }
 0x827   :  { %v2276_v38 = vpop.eup %2275  ;;  %2287 = vlog2.f32 %v1459_v9  ;;  %v1024_v13 = vmul.f32 0.6931472, %v2274_v5 }
 0x828   :  { %v1022_v60 = vmul.f32 0.6931472, %v2276_v38  ;;  %2289 = vlog2.f32 %v1461_v14 }
 0x829   :  { %2291 = vlog2.f32 %v1460_v41 }
 0x82a   :  { %1037 = vrot.lane.b32.xlu1 %v1014_v6, %s2313_s0  ;;  %1039 = vrot.lane.b32.xlu0 %v1016_v30, %s2313_s0  ;;  %v2278_v58 = vpop.eup %2277  ;;  %2293 = vlog2.f32 %v1462_v36 }
 0x82b   :  { %v2280_v19 = vpop.eup %2279  ;;  %v1026_v50 = vmul.f32 0.6931472, %v2278_v58 }
 0x82c   :  { %v1464_v51 = vmul.f32 0.6931472, %v2280_v19 }
 0x82e   :  { %1041 = vrot.lane.b32.xlu1 %v1018_v10, %s2313_s0  ;;  %1043 = vrot.lane.b32.xlu0 %v1020_v62, %s2313_s0  ;;  %v2282_v20 = vpop.eup %2281 }
 0x82f   :  { %v2284_v28 = vpop.eup %2283  ;;  %v1468_v32 = vmul.f32 0.6931472, %v2282_v20 }
 0x830   :  { %v2286_v43 = vpop.eup %2285  ;;  %v1466_v54 = vmul.f32 0.6931472, %v2284_v28 }
 0x831   :  { %v2288_v56 = vpop.eup %2287  ;;  %v1470_v1 = vmul.f32 0.6931472, %v2286_v43 }
 0x832   :  { %1045 = vrot.lane.b32.xlu1 %v1022_v60, %s2313_s0  ;;  %1047 = vrot.lane.b32.xlu0 %v1024_v13, %s2313_s0  ;;  %v2290_v34 = vpop.eup %2289  ;;  %v1472_v22 = vmul.f32 0.6931472, %v2288_v56 }
 0x833   :  { %v2292_v37 = vpop.eup %2291  ;;  %v1476_v35 = vmul.f32 0.6931472, %v2290_v34 }
 0x834   :  { %v1474_v63 = vmul.f32 0.6931472, %v2292_v37  ;;  %v2294_v42 = vpop.eup %2293 }
 0x835   :  { %v1478_v53 = vmul.f32 0.6931472, %v2294_v42 }
 0x836   :  { %1049 = vrot.lane.b32.xlu1 %v1026_v50, %s2313_s0  ;;  %1487 = vrot.lane.b32.xlu0 %v1464_v51, %s2313_s0 }
 0x83a   :  { %1489 = vrot.lane.b32.xlu1 %v1466_v54, %s2313_s0  ;;  %1491 = vrot.lane.b32.xlu0 %v1468_v32, %s2313_s0 }
 0x83e   :  { %1493 = vrot.lane.b32.xlu1 %v1470_v1, %s2313_s0  ;;  %1495 = vrot.lane.b32.xlu0 %v1472_v22, %s2313_s0 }
 0x842   :  { %1497 = vrot.lane.b32.xlu1 %v1474_v63, %s2313_s0  ;;  %1499 = vrot.lane.b32.xlu0 %v1476_v35, %s2313_s0 }
 0x846   :  { %1501 = vrot.lane.b32.xlu1 %v1478_v53, %s2313_s0  ;;  %1753 = vrot.lane.b32.xlu0 %v2724_v29, %s2313_s0  ;;  %v2173_v29 = vld [vmem:[%s2982_s9] sm:$0xff]  }
 0x847   :  { %2135 = vmatprep.subr.bf16.mxu1 %v2173_v29 }
 0x848   :  { %2136 = vmatpush3.bf16.msra.mxu1 %v2173_v29 }
 0x84a   :  { %1755 = vrot.lane.b32.xlu1 %v2726_v31, %s2313_s0  ;;  %1757 = vrot.lane.b32.xlu0 %v2739_v46, %s2313_s0  ;;  %v2174_v31 = vld [vmem:[%s2982_s9 + $0x8] sm:$0xff]  }
 0x84b   :  { %2137 = vmatprep.subr.bf16.mxu1 %v2174_v31 }
 0x84c   :  { %2138 = vmatpush3.bf16.msra.mxu1 %v2174_v31 }
 0x84e   :  { %1759 = vrot.lane.b32.xlu1 %v2741_v48, %s2313_s0  ;;  %1761 = vrot.lane.b32.xlu0 %v2761_v2, %s2313_s0 }
 0x852   :  { %1763 = vrot.lane.b32.xlu1 %v2763_v3, %s2313_s0  ;;  %1765 = vrot.lane.b32.xlu0 %v2778_v33, %s2313_s0 }
 0x856   :  { %1767 = vrot.lane.b32.xlu1 %v2780_v55, %s2313_s0 }
 0x888   :  { %v537_v46 = vpop.permute.xlu0 %536 }
 0x889   :  { %561 = vst.msk [vmem:[#allocation2] sm:$0xff] %vm560_vm3, %v537_v46 }
 0x88c   :  { %v539_v48 = vpop.permute.xlu1 %538  ;;  %v541_v2 = vpop.permute.xlu0 %540 }
 0x88d   :  { %562 = vst.msk [vmem:[#allocation2 + $0x8] sm:$0xff] %vm560_vm3, %v539_v48  ;;  %563 = vst.msk [vmem:[#allocation2 + $0x10] sm:$0xff] %vm560_vm3, %v541_v2  ;;  %v1535_v48 = vsub.s32 6, %v2434_v17  ;;  %v2311_v2 = vld [vmem:[%s2977_s10] sm:$0xff]  ;;  %s2315_s10 = smov 32  }
 0x890   :  { %v543_v3 = vpop.permute.xlu1 %542  ;;  %v545_v33 = vpop.permute.xlu0 %544  ;;  %v995_v39 = vld [vmem:[#allocation2] sm:$0xff] }
 0x891   :  { %564 = vst.msk [vmem:[#allocation2 + $0x18] sm:$0xff] %vm560_vm3, %v543_v3  ;;  %565 = vst.msk [vmem:[#allocation2 + $0x20] sm:$0xff] %vm560_vm3, %v545_v33  ;;  %v1536_v3 = vrot.slane %v2311_v2, %v1535_v48 }
 0x894   :  { %v547_v55 = vpop.permute.xlu1 %546  ;;  %v549_v4 = vpop.permute.xlu0 %548  ;;  %v996_v16 = vld [vmem:[#allocation2 + $0x8] sm:$0xff]  ;;  %v997_v21 = vld [vmem:[#allocation2 + $0x10] sm:$0xff] }
 0x895   :  { %566 = vst.msk [vmem:[#allocation2 + $0x28] sm:$0xff] %vm560_vm3, %v547_v55  ;;  %567 = vst.msk [vmem:[#allocation2 + $0x30] sm:$0xff] %vm560_vm3, %v549_v4 }
 0x898   :  { %v551_v40 = vpop.permute.xlu1 %550  ;;  %v1036_v0 = vpop.permute.xlu0 %1035  ;;  %v998_v12 = vld [vmem:[#allocation2 + $0x18] sm:$0xff]  ;;  %v999_v23 = vld [vmem:[#allocation2 + $0x20] sm:$0xff] }
 0x899   :  { %568 = vst.msk [vmem:[#allocation2 + $0x38] sm:$0xff] %vm560_vm3, %v551_v40  ;;  %v1059_v11 = vadd.f32 %v1036_v0, %v995_v39 }
 0x89b   :  { %1067 = vst.msk [vmem:[#allocation2] sm:$0xff] %vm560_vm3, %v1059_v11 }
 0x89c   :  { %v1038_v59 = vpop.permute.xlu1 %1037  ;;  %v1040_v49 = vpop.permute.xlu0 %1039  ;;  %v1000_v45 = vld [vmem:[#allocation2 + $0x28] sm:$0xff]  ;;  %v1001_v15 = vld [vmem:[#allocation2 + $0x30] sm:$0xff] }
 0x89d   :  { %v1060_v18 = vadd.f32 %v1038_v59, %v996_v16  ;;  %v1061_v8 = vadd.f32 %v1040_v49, %v997_v21 }
 0x89f   :  { %1068 = vst.msk [vmem:[#allocation2 + $0x8] sm:$0xff] %vm560_vm3, %v1060_v18  ;;  %1069 = vst.msk [vmem:[#allocation2 + $0x10] sm:$0xff] %vm560_vm3, %v1061_v8 }
 0x8a0   :  { %v1042_v57 = vpop.permute.xlu1 %1041  ;;  %v1044_v24 = vpop.permute.xlu0 %1043  ;;  %v1002_v6 = vld [vmem:[#allocation2 + $0x38] sm:$0xff] }
 0x8a1   :  { %v1062_v25 = vadd.f32 %v1042_v57, %v998_v12  ;;  %v1063_v27 = vadd.f32 %v1044_v24, %v999_v23 }
 0x8a2   :  { %v1447_v7 = vld [vmem:[#allocation2] sm:$0xff] }
 0x8a3   :  { %1070 = vst.msk [vmem:[#allocation2 + $0x18] sm:$0xff] %vm560_vm3, %v1062_v25  ;;  %1071 = vst.msk [vmem:[#allocation2 + $0x20] sm:$0xff] %vm560_vm3, %v1063_v27 }
 0x8a4   :  { %v1046_v44 = vpop.permute.xlu1 %1045  ;;  %v1048_v26 = vpop.permute.xlu0 %1047 }
 0x8a5   :  { %v1064_v52 = vadd.f32 %v1046_v44, %v1000_v45  ;;  %v1065_v61 = vadd.f32 %v1048_v26, %v1001_v15 }
 0x8a6   :  { %v1448_v10 = vld [vmem:[#allocation2 + $0x8] sm:$0xff]  ;;  %v1449_v38 = vld [vmem:[#allocation2 + $0x10] sm:$0xff] }
 0x8a7   :  { %1072 = vst.msk [vmem:[#allocation2 + $0x28] sm:$0xff] %vm560_vm3, %v1064_v52  ;;  %1073 = vst.msk [vmem:[#allocation2 + $0x30] sm:$0xff] %vm560_vm3, %v1065_v61  ;;  %v1646_v61 = vsub.s32 7, %v2434_v17 }
 0x8a8   :  { %v1050_v30 = vpop.permute.xlu1 %1049  ;;  %v1488_v47 = vpop.permute.xlu0 %1487 }
 0x8a9   :  { %v1066_v9 = vadd.f32 %v1050_v30, %v1002_v6  ;;  %v1511_v5 = vadd.f32 %v1488_v47, %v1447_v7  ;;  %v1647_v6 = vrot.slane %v2311_v2, %v1646_v61 }
 0x8aa   :  { %v1450_v60 = vld [vmem:[#allocation2 + $0x18] sm:$0xff]  ;;  %v1451_v19 = vld [vmem:[#allocation2 + $0x20] sm:$0xff] }
 0x8ab   :  { %1074 = vst.msk [vmem:[#allocation2 + $0x38] sm:$0xff] %vm560_vm3, %v1066_v9  ;;  %1519 = vst.msk [vmem:[#allocation2] sm:$0xff] %vm560_vm3, %v1511_v5 }
 0x8ac   :  { %v1490_v62 = vpop.permute.xlu1 %1489  ;;  %v1492_v14 = vpop.permute.xlu0 %1491 }
 0x8ad   :  { %v1512_v41 = vadd.f32 %v1490_v62, %v1448_v10  ;;  %v1513_v58 = vadd.f32 %v1492_v14, %v1449_v38 }
 0x8ae   :  { %v1452_v51 = vld [vmem:[#allocation2 + $0x28] sm:$0xff]  ;;  %v1453_v43 = vld [vmem:[#allocation2 + $0x30] sm:$0xff] }
 0x8af   :  { %1520 = vst.msk [vmem:[#allocation2 + $0x8] sm:$0xff] %vm560_vm3, %v1512_v41  ;;  %1521 = vst.msk [vmem:[#allocation2 + $0x10] sm:$0xff] %vm560_vm3, %v1513_v58 }
 0x8b0   :  { %v1494_v13 = vpop.permute.xlu1 %1493  ;;  %v1496_v36 = vpop.permute.xlu0 %1495 }
 0x8b1   :  { %v1514_v20 = vadd.f32 %v1494_v13, %v1450_v60  ;;  %v1515_v50 = vadd.f32 %v1496_v36, %v1451_v19 }
 0x8b2   :  { %v1454_v1 = vld [vmem:[#allocation2 + $0x38] sm:$0xff]  ;;  %v1737_v35 = vld [vmem:[#allocation2] sm:$0xff] }
 0x8b3   :  { %1522 = vst.msk [vmem:[#allocation2 + $0x18] sm:$0xff] %vm560_vm3, %v1514_v20  ;;  %1523 = vst.msk [vmem:[#allocation2 + $0x20] sm:$0xff] %vm560_vm3, %v1515_v50 }
 0x8b4   :  { %v1498_v28 = vpop.permute.xlu1 %1497  ;;  %v1500_v54 = vpop.permute.xlu0 %1499 }
 0x8b5   :  { %v1516_v32 = vadd.f32 %v1498_v28, %v1452_v51  ;;  %v1517_v56 = vadd.f32 %v1500_v54, %v1453_v43 }
 0x8b6   :  { %v1739_v34 = vld [vmem:[#allocation2 + $0x10] sm:$0xff]  ;;  %v1738_v42 = vld [vmem:[#allocation2 + $0x8] sm:$0xff] }
 0x8b7   :  { %1524 = vst.msk [vmem:[#allocation2 + $0x28] sm:$0xff] %vm560_vm3, %v1516_v32  ;;  %1525 = vst.msk [vmem:[#allocation2 + $0x30] sm:$0xff] %vm560_vm3, %v1517_v56  ;;  %1789 = vrot.lane.b32.xlu0 %v1739_v34, %s2312_s20 }
 0x8b8   :  { %v1502_v22 = vpop.permute.xlu1 %1501  ;;  %v1754_v20 = vpop.permute.xlu0 %1753 }
 0x8b9   :  { %v1518_v37 = vadd.f32 %v1502_v22, %v1454_v1 }
 0x8ba   :  { %v1740_v63 = vld [vmem:[#allocation2 + $0x18] sm:$0xff]  ;;  %v1741_v31 = vld [vmem:[#allocation2 + $0x20] sm:$0xff] }
 0x8bb   :  { %1526 = vst.msk [vmem:[#allocation2 + $0x38] sm:$0xff] %vm560_vm3, %v1518_v37  ;;  %1791 = vrot.lane.b32.xlu1 %v1740_v63, %s2312_s20  ;;  %1785 = vrot.lane.b32.xlu0 %v1737_v35, %s2312_s20 }
 0x8bc   :  { %v1756_v50 = vpop.permute.xlu1 %1755  ;;  %v1758_v51 = vpop.permute.xlu0 %1757 }
 0x8be   :  { %v1743_v53 = vld [vmem:[#allocation2 + $0x30] sm:$0xff]  ;;  %v1742_v46 = vld [vmem:[#allocation2 + $0x28] sm:$0xff] }
 0x8bf   :  { %1787 = vrot.lane.b32.xlu1 %v1738_v42, %s2312_s20  ;;  %1797 = vrot.lane.b32.xlu0 %v1743_v53, %s2312_s20 }
 0x8c0   :  { %v1760_v28 = vpop.permute.xlu1 %1759  ;;  %v1762_v43 = vpop.permute.xlu0 %1761 }
 0x8c2   :  { %v1744_v29 = vld [vmem:[#allocation2 + $0x38] sm:$0xff] }
 0x8c3   :  { %1799 = vrot.lane.b32.xlu1 %v1744_v29, %s2312_s20  ;;  %1793 = vrot.lane.b32.xlu0 %v1741_v31, %s2312_s20 }
 0x8c4   :  { %v1764_v54 = vpop.permute.xlu1 %1763  ;;  %v1766_v32 = vpop.permute.xlu0 %1765 }
 0x8c7   :  { %1795 = vrot.lane.b32.xlu1 %v1742_v46, %s2312_s20 }
 0x8c8   :  { %v1768_v56 = vpop.permute.xlu1 %1767 }
 0x8da   :  { %v2129_v33 = vpop.f32.mrb[32].mxu0 }
 0x8db   :  { %v1601_v55 = vpop.f32.mrb[33].mxu0  ;;  %v1610_v40 = vadd.f32 %v2129_v33, %v1536_v3 }
 0x8dc   :  { %v2130_v4 = vpop.f32.mrb[34].mxu0  ;;  %v1602_v11 = vadd.f32 %v1601_v55, %v1536_v3 }
 0x8dd   :  { %v1613_v39 = vadd.f32 %v2130_v4, %v1536_v3  ;;  %v1604_v0 = vpop.f32.mrb[35].mxu0 }
 0x8de   :  { %v1605_v16 = vadd.f32 %v1604_v0, %v1536_v3 }
 0x8df   :  { %v1633_v59 = vpack.c.bf16 %v1613_v39, %v1610_v40 }
 0x8e0   :  { %v1632_v21 = vpack.c.bf16 %v1605_v16, %v1602_v11 }
 0x8e2   :  { %2295 = vtanh.bf16 %v1632_v21 }
 0x8e3   :  { %2297 = vtanh.bf16 %v1633_v59 }
 0x8e5   :  { %v2133_v49 = vpop.f32.mrb[36].mxu0 }
 0x8e6   :  { %v1617_v18 = vpop.f32.mrb[37].mxu0  ;;  %v1626_v12 = vadd.f32 %v2133_v49, %v1536_v3 }
 0x8e7   :  { %v2134_v8 = vpop.f32.mrb[38].mxu0  ;;  %v1618_v24 = vadd.f32 %v1617_v18, %v1536_v3 }
 0x8e8   :  { %v1629_v57 = vadd.f32 %v2134_v8, %v1536_v3  ;;  %v1620_v23 = vpop.f32.mrb[39].mxu0 }
 0x8e9   :  { %v1621_v25 = vadd.f32 %v1620_v23, %v1536_v3 }
 0x8ea   :  { %v1635_v27 = vpack.c.bf16 %v1629_v57, %v1626_v12 }
 0x8eb   :  { %v1634_v45 = vpack.c.bf16 %v1621_v25, %v1618_v24 }
 0x8ed   :  { %v2296_v44 = vpop.eup %2295  ;;  %2299 = vtanh.bf16 %v1634_v45 }
 0x8ee   :  { %v2298_v15 = vpop.eup %2297  ;;  %2301 = vtanh.bf16 %v1635_v27  ;;  %2139 = vmatprep.mubr.msk.bf16.mxu1 %vm96_vm0, %v2296_v44 }
 0x8ef   :  { %2140 = vmatmul.mubr.msk.bf16.vlgmr.msra.gmra.mrb[32].mxu1 %vm96_vm0, %v2298_v15 }
 0x8f8   :  { %v2300_v26 = vpop.eup %2299 }
 0x8f9   :  { %v2302_v52 = vpop.eup %2301  ;;  %2143 = vmatprep.mubr.msk.bf16.mxu1 %vm96_vm0, %v2300_v26 }
 0x8fa   :  { %2144 = vmatmul.mubr.msk.bf16.gmra.mrb[36].mxu1 %vm96_vm0, %v2302_v52 }
 0x929   :  { %v1790_v34 = vpop.permute.xlu0 %1789 }
 0x92a   :  { %v1843_v29 = vsel %vm560_vm3, %v1758_v51, %v1790_v34 }
 0x92d   :  { %v1792_v1 = vpop.permute.xlu1 %1791  ;;  %v1786_v22 = vpop.permute.xlu0 %1785 }
 0x92e   :  { %v1844_v48 = vsel %vm560_vm3, %v1760_v28, %v1792_v1  ;;  %v1841_v55 = vsel %vm560_vm3, %v1754_v20, %v1786_v22 }
 0x931   :  { %v1788_v37 = vpop.permute.xlu1 %1787  ;;  %v1798_v63 = vpop.permute.xlu0 %1797 }
 0x932   :  { %v1842_v0 = vsel %vm560_vm3, %v1756_v50, %v1788_v37  ;;  %v1847_v25 = vsel %vm560_vm3, %v1766_v32, %v1798_v63 }
 0x935   :  { %v1800_v35 = vpop.permute.xlu1 %1799  ;;  %v1794_v42 = vpop.permute.xlu0 %1793 }
 0x936   :  { %v1845_v49 = vsel %vm560_vm3, %v1762_v43, %v1794_v42  ;;  %v1848_v15 = vsel %vm560_vm3, %v1768_v56, %v1800_v35 }
 0x939   :  { %v1796_v53 = vpop.permute.xlu1 %1795 }
 0x93a   :  { %v1846_v12 = vsel %vm560_vm3, %v1764_v54, %v1796_v53 }
 0x9c2   :  { %v2141_v30 = vpop.f32.mrb[32].mxu1 }
 0x9c3   :  { %v1715_v7 = vadd.f32 %v2141_v30, %v1647_v6  ;;  %v1706_v47 = vpop.f32.mrb[33].mxu1 }
 0x9c4   :  { %v2142_v9 = vpop.f32.mrb[34].mxu1  ;;  %v1707_v62 = vadd.f32 %v1706_v47, %v1647_v6 }
 0x9c5   :  { %v1718_v5 = vadd.f32 %v2142_v9, %v1647_v6  ;;  %v1709_v10 = vpop.f32.mrb[35].mxu1  ;;  %1821 = vrot.lane.b32.xlu0 %v1715_v7, %s2315_s10 }
 0x9c6   :  { %v1710_v38 = vadd.f32 %v1709_v10, %v1647_v6 }
 0x9c7   :  { %1823 = vrot.lane.b32.xlu1 %v1718_v5, %s2315_s10 }
 0x9c9   :  { %1817 = vrot.lane.b32.xlu0 %v1707_v62, %s2315_s10 }
 0x9cb   :  { %1819 = vrot.lane.b32.xlu1 %v1710_v38, %s2315_s10 }
 0x9cd   :  { %v2145_v14 = vpop.f32.mrb[36].mxu1 }
 0x9ce   :  { %v1722_v41 = vpop.f32.mrb[37].mxu1  ;;  %v1731_v19 = vadd.f32 %v2145_v14, %v1647_v6 }
 0x9cf   :  { %v1723_v58 = vadd.f32 %v1722_v41, %v1647_v6  ;;  %v2146_v60 = vpop.f32.mrb[38].mxu1 }
 0x9d0   :  { %v1725_v13 = vpop.f32.mrb[39].mxu1  ;;  %v1734_v36 = vadd.f32 %v2146_v60, %v1647_v6 }
 0x9d1   :  { %v1726_v17 = vadd.f32 %v1725_v13, %v1647_v6  ;;  %1825 = vrot.lane.b32.xlu0 %v1723_v58, %s2315_s10 }
 0x9d3   :  { %1827 = vrot.lane.b32.xlu1 %v1726_v17, %s2315_s10 }
 0x9d5   :  { %1829 = vrot.lane.b32.xlu0 %v1731_v19, %s2315_s10 }
 0x9d7   :  { %1831 = vrot.lane.b32.xlu1 %v1734_v36, %s2315_s10 }
 0xa37   :  { %v1822_v31 = vpop.permute.xlu0 %1821 }
 0xa38   :  { %v1851_v46 = vsel %vm96_vm0, %v1843_v29, %v1822_v31 }
 0xa39   :  { %v1860_v2 = vsel %vm1857_vm5, %v1851_v46, 0.0  ;;  %v1824_v3 = vpop.permute.xlu1 %1823 }
 0xa3a   :  { %1868 = vst [vmem:[%s2983_s11 + $0x10] sm:$0xff] %v1860_v2  ;;  %v1852_v33 = vsel %vm96_vm0, %v1844_v48, %v1824_v3 }
 0xa3b   :  { %v1861_v4 = vsel %vm1857_vm5, %v1852_v33, 0.0  ;;  %v1818_v40 = vpop.permute.xlu0 %1817 }
 0xa3c   :  { %1869 = vst [vmem:[%s2983_s11 + $0x18] sm:$0xff] %v1861_v4  ;;  %v1849_v39 = vsel %vm96_vm0, %v1841_v55, %v1818_v40 }
 0xa3d   :  { %v1858_v11 = vsel %vm1857_vm5, %v1849_v39, 0.0  ;;  %v1820_v16 = vpop.permute.xlu1 %1819 }
 0xa3e   :  { %1866 = vst [vmem:[%s2983_s11] sm:$0xff] %v1858_v11  ;;  %v1850_v59 = vsel %vm96_vm0, %v1842_v0, %v1820_v16 }
 0xa3f   :  { %v1859_v21 = vsel %vm1857_vm5, %v1850_v59, 0.0 }
 0xa40   :  { %1867 = vst [vmem:[%s2983_s11 + $0x8] sm:$0xff] %v1859_v21 }
 0xa43   :  { %v1826_v18 = vpop.permute.xlu0 %1825 }
 0xa44   :  { %v1853_v8 = vsel %vm96_vm0, %v1845_v49, %v1826_v18 }
 0xa45   :  { %v1862_v57 = vsel %vm1857_vm5, %v1853_v8, 0.0  ;;  %v1828_v23 = vpop.permute.xlu1 %1827 }
 0xa46   :  { %1870 = vst [vmem:[%s2983_s11 + $0x20] sm:$0xff] %v1862_v57  ;;  %v1854_v24 = vsel %vm96_vm0, %v1846_v12, %v1828_v23 }
 0xa47   :  { %v1863_v27 = vsel %vm1857_vm5, %v1854_v24, 0.0  ;;  %v1830_v45 = vpop.permute.xlu0 %1829 }
 0xa48   :  { %1871 = vst [vmem:[%s2983_s11 + $0x28] sm:$0xff] %v1863_v27  ;;  %v1855_v44 = vsel %vm96_vm0, %v1847_v25, %v1830_v45 }
 0xa49   :  { %v1864_v26 = vsel %vm1857_vm5, %v1855_v44, 0.0  ;;  %v1832_v52 = vpop.permute.xlu1 %1831 }
 0xa4a   :  { %1872 = vst [vmem:[%s2983_s11 + $0x30] sm:$0xff] %v1864_v26  ;;  %v1856_v61 = vsel %vm96_vm0, %v1848_v15, %v1832_v52 }
 0xa4b   :  { %v1865_v6 = vsel %vm1857_vm5, %v1856_v61, 0.0 }
 0xa4c   :  { %1873 = vst [vmem:[%s2983_s11 + $0x38] sm:$0xff] %v1865_v6 }

</bundles_post_ra>
